<compile_context>
chip_gen: v5e
topology: v5e:2x2
jax: 0.10.0
libtpu: 0.0.40
codegen_flags: <defaults>
</compile_context>

<pallas_src>
import functools
import math

import jax
import jax.numpy as jnp
from jax.experimental import pallas as pl
from jax.experimental.pallas import tpu as pltpu

EPS = 1e-5
_VMEM_LIMIT = 64 * 1024 * 1024  # explicit VMEM budget; fits v7x's 64 MiB physical


def _row_block(L, target=256):
    """Largest row tile <= target that divides L and is a multiple of 8 (else L)."""
    if L <= target:
        return L
    b = (target // 8) * 8
    while b >= 8:
        if L % b == 0:
            return b
        b -= 8
    return L


# --------------------------------------------------------------------------- #
# Kernel A: LayerNorm1 fused into the QKV in-projection.
# --------------------------------------------------------------------------- #
def _ln_qkv_kernel(x_ref, g_ref, b_ref, w_ref, wb_ref, q_ref, k_ref, v_ref):
    x = x_ref[0].astype(jnp.float32)                      # (bl, E)
    mu = jnp.mean(x, axis=-1, keepdims=True)
    xc = x - mu
    var = jnp.mean(xc * xc, axis=-1, keepdims=True)
    y = xc * jax.lax.rsqrt(var + EPS)
    y = y * g_ref[...].astype(jnp.float32) + b_ref[...].astype(jnp.float32)

    w = w_ref[...]                                        # (E, 3E): MXU in weight dtype
    qkv = jnp.dot(y.astype(w.dtype), w, preferred_element_type=jnp.float32)
    qkv = (qkv + wb_ref[...].astype(jnp.float32)).astype(q_ref.dtype)

    E = x.shape[-1]
    q_ref[0] = qkv[:, :E]
    k_ref[0] = qkv[:, E:2 * E]
    v_ref[0] = qkv[:, 2 * E:]


# --------------------------------------------------------------------------- #
# Kernel B: flash-style attention, online softmax across KV tiles.
# Heads stay packed along the lane (E) dim; per-head work uses static lane
# slices (unrolled loop), so q/k/v/o blocks are always lane-dense (rows, E).
# --------------------------------------------------------------------------- #
def _flash_attn_kernel(q_ref, k_ref, v_ref, o_ref, m_sc, l_sc, acc_sc, *,
                       heads, scale):
    ki = pl.program_id(2)

    @pl.when(ki == 0)
    def _init():
        m_sc[...] = jnp.full(m_sc.shape, -jnp.inf, m_sc.dtype)
        l_sc[...] = jnp.zeros(l_sc.shape, l_sc.dtype)
        acc_sc[...] = jnp.zeros(acc_sc.shape, acc_sc.dtype)

    q = q_ref[0]                                          # (blq, E)
    k = k_ref[0]                                          # (blkv, E)
    v = v_ref[0]                                          # (blkv, E)
    E = q.shape[-1]
    dh = E // heads

    for h in range(heads):                                # unrolled, H is small/static
        sl = slice(h * dh, (h + 1) * dh)
        qh, kh, vh = q[:, sl], k[:, sl], v[:, sl]
        s = jax.lax.dot_general(qh, kh, (((1,), (1,)), ((), ())),
                                preferred_element_type=jnp.float32) * scale
        m_prev = m_sc[:, h:h + 1]
        m_new = jnp.maximum(m_prev, jnp.max(s, axis=-1, keepdims=True))
        alpha = jnp.exp(m_prev - m_new)
        p = jnp.exp(s - m_new)
        l_sc[:, h:h + 1] = alpha * l_sc[:, h:h + 1] + jnp.sum(p, axis=-1,
                                                              keepdims=True)
        acc_sc[:, sl] = alpha * acc_sc[:, sl] + jnp.dot(
            p.astype(vh.dtype), vh, preferred_element_type=jnp.float32)
        m_sc[:, h:h + 1] = m_new

    @pl.when(ki == pl.num_programs(2) - 1)
    def _finalize():
        parts = []
        for h in range(heads):
            sl = slice(h * dh, (h + 1) * dh)
            # exact reciprocal keeps the 1e-4 check; approx=True moves it to the EUP.
            inv = pl.reciprocal(l_sc[:, h:h + 1], approx=False)
            parts.append(acc_sc[:, sl] * inv)
        o_ref[0] = jnp.concatenate(parts, axis=-1).astype(o_ref.dtype)


# --------------------------------------------------------------------------- #
# Kernel C: out-projection + residual + LN2 + FFN(+ReLU) + residual.
# --------------------------------------------------------------------------- #
def _outproj_ffn_kernel(ctx_ref, res_ref, wo_ref, bo_ref, g2_ref, b2_ref,
                        w1_ref, f1b_ref, w2_ref, f2b_ref, o_ref):
    ctx = ctx_ref[0]                                      # (bl, E)
    wo = wo_ref[...]
    attn = jnp.dot(ctx.astype(wo.dtype), wo, preferred_element_type=jnp.float32)
    attn = attn + bo_ref[...].astype(jnp.float32) + res_ref[0].astype(jnp.float32)

    mu = jnp.mean(attn, axis=-1, keepdims=True)
    xc = attn - mu
    var = jnp.mean(xc * xc, axis=-1, keepdims=True)
    n2 = xc * jax.lax.rsqrt(var + EPS)
    n2 = n2 * g2_ref[...].astype(jnp.float32) + b2_ref[...].astype(jnp.float32)

    w1 = w1_ref[...]
    h = jnp.dot(n2.astype(w1.dtype), w1, preferred_element_type=jnp.float32)
    h = jnp.maximum(h + f1b_ref[...].astype(jnp.float32), 0.0)

    w2 = w2_ref[...]
    out = jnp.dot(h.astype(w2.dtype), w2, preferred_element_type=jnp.float32)
    out = out + f2b_ref[...].astype(jnp.float32) + attn
    o_ref[0] = out.astype(o_ref.dtype)


# --------------------------------------------------------------------------- #
# Decoder layer wrapper.
# --------------------------------------------------------------------------- #
def decoder_layer(x, params, heads):
    """x: (L, N, E) sequence-major, like torch nn.MultiheadAttention (batch_first=False)."""
    L, N, E = x.shape
    H = heads
    assert E % H == 0
    dh = E // H
    F = params["w_ff1"].shape[1]

    # Batch-major canonical layout for the kernels (single relayout in/out).
    xb = jnp.transpose(x, (1, 0, 2))                      # (N, L, E)

    bl = _row_block(L)          # token tile for LN/matmul kernels
    blq = _row_block(L)         # attention query tile
    blkv = _row_block(L)        # attention kv tile
    n_lt, n_q, n_kv = L // bl, L // blq, L // blkv

    row = lambda v: v.reshape(1, -1)
    tok_spec = pl.BlockSpec((1, bl, E), lambda n, t: (n, t, 0))
    vec_e = pl.BlockSpec((1, E), lambda n, t: (0, 0))

    # ---- Kernel A: LN1 + QKV projection ------------------------------------
    q, k, v = pl.pallas_call(
        _ln_qkv_kernel,
        out_shape=(jax.ShapeDtypeStruct((N, L, E), x.dtype),) * 3,
        grid=(N, n_lt),
        in_specs=[
            tok_spec,                                               # x
            vec_e, vec_e,                                           # ln1 gamma/beta
            pl.BlockSpec((E, 3 * E), lambda n, t: (0, 0)),          # w_in (resident)
            pl.BlockSpec((1, 3 * E), lambda n, t: (0, 0)),          # b_in
        ],
        out_specs=[tok_spec, tok_spec, tok_spec],
        compiler_params=pltpu.CompilerParams(
            dimension_semantics=("parallel", "parallel"),
            vmem_limit_bytes=_VMEM_LIMIT),
    )(xb, row(params["ln1_g"]), row(params["ln1_b"]),
      params["w_in"], row(params["b_in"]))

    # ---- Kernel B: flash attention ------------------------------------------
    scale = 1.0 / math.sqrt(dh)
    ctx = pl.pallas_call(
        functools.partial(_flash_attn_kernel, heads=H, scale=scale),
        out_shape=jax.ShapeDtypeStruct((N, L, E), x.dtype),
        grid=(N, n_q, n_kv),
        in_specs=[
            pl.BlockSpec((1, blq, E), lambda n, qi, ki: (n, qi, 0)),   # q
            pl.BlockSpec((1, blkv, E), lambda n, qi, ki: (n, ki, 0)),  # k
            pl.BlockSpec((1, blkv, E), lambda n, qi, ki: (n, ki, 0)),  # v
        ],
        out_specs=pl.BlockSpec((1, blq, E), lambda n, qi, ki: (n, qi, 0)),
        scratch_shapes=[
            pltpu.VMEM((blq, H), jnp.float32),    # running max per head
            pltpu.VMEM((blq, H), jnp.float32),    # running denom per head
            pltpu.VMEM((blq, E), jnp.float32),    # running weighted sum (heads packed)
        ],
        compiler_params=pltpu.CompilerParams(
            dimension_semantics=("parallel", "parallel", "arbitrary"),
            vmem_limit_bytes=_VMEM_LIMIT),
    )(q, k, v)

    # ---- Kernel C: out-proj + residual + LN2 + FFN + residual ---------------
    out_b = pl.pallas_call(
        _outproj_ffn_kernel,
        out_shape=jax.ShapeDtypeStruct((N, L, E), x.dtype),
        grid=(N, n_lt),
        in_specs=[
            tok_spec,                                               # ctx
            tok_spec,                                               # residual x
            pl.BlockSpec((E, E), lambda n, t: (0, 0)),              # w_out
            vec_e,                                                  # b_out
            vec_e, vec_e,                                           # ln2 gamma/beta
            pl.BlockSpec((E, F), lambda n, t: (0, 0)),              # w_ff1
            pl.BlockSpec((1, F), lambda n, t: (0, 0)),              # b_ff1
            pl.BlockSpec((F, E), lambda n, t: (0, 0)),              # w_ff2
            vec_e,                                                  # b_ff2
        ],
        out_specs=tok_spec,
        input_output_aliases={1: 0},   # residual input reuses the output buffer
        compiler_params=pltpu.CompilerParams(
            dimension_semantics=("parallel", "parallel"),
            vmem_limit_bytes=_VMEM_LIMIT),
    )(ctx, xb, params["w_out"], row(params["b_out"]),
      row(params["ln2_g"]), row(params["ln2_b"]),
      params["w_ff1"], row(params["b_ff1"]),
      params["w_ff2"], row(params["b_ff2"]))

    return jnp.transpose(out_b, (1, 0, 2))                # back to (L, N, E)


# ------------------------------ reference ----------------------------------- #
def decoder_layer_ref(x, p, heads):
    L, N, E = x.shape
    H = heads
    dh = E // H

    def ln(t, g, b):
        mu = t.mean(-1, keepdims=True)
        var = ((t - mu) ** 2).mean(-1, keepdims=True)
        return (t - mu) / jnp.sqrt(var + EPS) * g + b

    n1 = ln(x, p["ln1_g"], p["ln1_b"])
    qkv = n1 @ p["w_in"] + p["b_in"]
    q, k, v = jnp.split(qkv, 3, axis=-1)

    def hsplit(t):
        return t.reshape(L, N, H, dh).transpose(1, 2, 0, 3)     # (N, H, L, dh)

    qh, kh, vh = hsplit(q), hsplit(k), hsplit(v)
    s = jnp.einsum("bhld,bhmd->bhlm", qh, kh) / math.sqrt(dh)
    pw = jax.nn.softmax(s, axis=-1)
    ctx = jnp.einsum("bhlm,bhmd->bhld", pw, vh)
    ctx = ctx.transpose(2, 0, 1, 3).reshape(L, N, E)
    attn = ctx @ p["w_out"] + p["b_out"] + x
    n2 = ln(attn, p["ln2_g"], p["ln2_b"])
    hmid = jnp.maximum(n2 @ p["w_ff1"] + p["b_ff1"], 0.0)
    return hmid @ p["w_ff2"] + p["b_ff2"] + attn


# --------------------------------- main -------------------------------------- #
if __name__ == "__main__":
    L, N, E, H, F = 8, 2, 32, 4, 64   # seq, batch, embed, heads, ff_dim
    key = jax.random.PRNGKey(0)
    ks = jax.random.split(key, 9)

    # Weights stored as (in, out), i.e. transposed relative to torch Linear (out, in).
    params = {
        "ln1_g": jnp.ones((E,), jnp.float32),
        "ln1_b": jnp.zeros((E,), jnp.float32),
        "ln2_g": jnp.ones((E,), jnp.float32),
        "ln2_b": jnp.zeros((E,), jnp.float32),
        "w_in":  0.05 * jax.random.normal(ks[0], (E, 3 * E), jnp.float32),
        "b_in":  0.01 * jax.random.normal(ks[1], (3 * E,), jnp.float32),
        "w_out": 0.05 * jax.random.normal(ks[2], (E, E), jnp.float32),
        "b_out": 0.01 * jax.random.normal(ks[3], (E,), jnp.float32),
        "w_ff1": 0.05 * jax.random.normal(ks[4], (E, F), jnp.float32),
        "b_ff1": 0.01 * jax.random.normal(ks[5], (F,), jnp.float32),
        "w_ff2": 0.05 * jax.random.normal(ks[6], (F, E), jnp.float32),
        "b_ff2": 0.01 * jax.random.normal(ks[7], (E,), jnp.float32),
    }

    x = jax.random.normal(ks[8], (L, N, E), jnp.float32)

    fwd = jax.jit(functools.partial(decoder_layer, heads=H))
    out = fwd(x, params)
    out = jax.block_until_ready(out)

    ref = decoder_layer_ref(x, params, heads=H)
    assert out.shape == (L, N, E)
    assert jnp.allclose(out, ref, atol=1e-4, rtol=1e-4), "mismatch vs JAX reference"

    print("KERNEL_OK")
</pallas_src>

<mosaic_0001>
module attributes {stable_mosaic.version = 11 : i64} {
  func.func @_ln_qkv_kernel(%arg0: i32, %arg1: i32, %arg2: memref<1x8x32xf32, #tpu.memory_space<vmem>>, %arg3: memref<1x32xf32, #tpu.memory_space<vmem>>, %arg4: memref<1x32xf32, #tpu.memory_space<vmem>>, %arg5: memref<32x96xf32, #tpu.memory_space<vmem>>, %arg6: memref<1x96xf32, #tpu.memory_space<vmem>>, %arg7: memref<1x8x32xf32, #tpu.memory_space<vmem>>, %arg8: memref<1x8x32xf32, #tpu.memory_space<vmem>>, %arg9: memref<1x8x32xf32, #tpu.memory_space<vmem>>) attributes {dimension_semantics = [#tpu.dimension_semantics<parallel>, #tpu.dimension_semantics<parallel>], iteration_bounds = array<i64: 2, 1>, scalar_prefetch = 0 : i64, scratch_operands = 0 : i64, tpu.core_type = #tpu.core_type<tc>, window_params = [{transform_indices = @transform_0, window_bounds = array<i64: 1, 8, 32>}, {pipeline_mode = #tpu.pipeline_mode<synchronous>, transform_indices = @transform_1, window_bounds = array<i64: 1, 32>}, {pipeline_mode = #tpu.pipeline_mode<synchronous>, transform_indices = @transform_2, window_bounds = array<i64: 1, 32>}, {pipeline_mode = #tpu.pipeline_mode<synchronous>, transform_indices = @transform_3, window_bounds = array<i64: 32, 96>}, {pipeline_mode = #tpu.pipeline_mode<synchronous>, transform_indices = @transform_4, window_bounds = array<i64: 1, 96>}, {transform_indices = @transform_5, window_bounds = array<i64: 1, 8, 32>}, {transform_indices = @transform_6, window_bounds = array<i64: 1, 8, 32>}, {transform_indices = @transform_7, window_bounds = array<i64: 1, 8, 32>}]} {
    %c0 = arith.constant 0 : index
    %c0_0 = arith.constant 0 : index
    %c0_1 = arith.constant 0 : index
    %0 = vector.load %arg2[%c0, %c0_0, %c0_1] : memref<1x8x32xf32, #tpu.memory_space<vmem>>, vector<1x8x32xf32>
    %1 = vector.shape_cast %0 : vector<1x8x32xf32> to vector<8x32xf32>
    %cst = arith.constant dense<0.000000e+00> : vector<8xf32>
    %2 = vector.multi_reduction <add>, %1, %cst [1] : vector<8x32xf32> to vector<8xf32>
    %3 = vector.shape_cast %2 : vector<8xf32> to vector<8x1xf32>
    %cst_2 = arith.constant 3.200000e+01 : f32
    %4 = vector.broadcast %cst_2 : f32 to vector<8x1xf32>
    %5 = arith.divf %3, %4 : vector<8x1xf32>
    %6 = vector.broadcast %5 : vector<8x1xf32> to vector<8x32xf32>
    %7 = arith.subf %1, %6 : vector<8x32xf32>
    %8 = arith.mulf %7, %7 : vector<8x32xf32>
    %cst_3 = arith.constant dense<0.000000e+00> : vector<8xf32>
    %9 = vector.multi_reduction <add>, %8, %cst_3 [1] : vector<8x32xf32> to vector<8xf32>
    %10 = vector.shape_cast %9 : vector<8xf32> to vector<8x1xf32>
    %cst_4 = arith.constant 3.200000e+01 : f32
    %11 = vector.broadcast %cst_4 : f32 to vector<8x1xf32>
    %12 = arith.divf %10, %11 : vector<8x1xf32>
    %cst_5 = arith.constant 9.99999974E-6 : f32
    %13 = vector.broadcast %cst_5 : f32 to vector<8x1xf32>
    %14 = arith.addf %12, %13 : vector<8x1xf32>
    %15 = math.rsqrt %14 : vector<8x1xf32>
    %16 = vector.broadcast %15 : vector<8x1xf32> to vector<8x32xf32>
    %17 = arith.mulf %7, %16 : vector<8x32xf32>
    %c0_6 = arith.constant 0 : index
    %c0_7 = arith.constant 0 : index
    %18 = vector.load %arg3[%c0_6, %c0_7] : memref<1x32xf32, #tpu.memory_space<vmem>>, vector<1x32xf32>
    %19 = vector.broadcast %18 : vector<1x32xf32> to vector<8x32xf32>
    %20 = arith.mulf %17, %19 : vector<8x32xf32>
    %c0_8 = arith.constant 0 : index
    %c0_9 = arith.constant 0 : index
    %21 = vector.load %arg4[%c0_8, %c0_9] : memref<1x32xf32, #tpu.memory_space<vmem>>, vector<1x32xf32>
    %22 = vector.broadcast %21 : vector<1x32xf32> to vector<8x32xf32>
    %23 = arith.addf %20, %22 : vector<8x32xf32>
    %c0_10 = arith.constant 0 : index
    %c0_11 = arith.constant 0 : index
    %24 = vector.load %arg5[%c0_10, %c0_11] : memref<32x96xf32, #tpu.memory_space<vmem>>, vector<32x96xf32>
    %cst_12 = arith.constant dense<0.000000e+00> : vector<8x96xf32>
    %25 = tpu.matmul %23, %24, %cst_12 {dimension_numbers = #tpu.dot_dimension_numbers<[1], [0], [0], [1], [0, 0, 1, 1], [], []>} : vector<8x32xf32>, vector<32x96xf32>, vector<8x96xf32> -> vector<8x96xf32>
    %c0_13 = arith.constant 0 : index
    %c0_14 = arith.constant 0 : index
    %26 = vector.load %arg6[%c0_13, %c0_14] : memref<1x96xf32, #tpu.memory_space<vmem>>, vector<1x96xf32>
    %27 = vector.broadcast %26 : vector<1x96xf32> to vector<8x96xf32>
    %28 = arith.addf %25, %27 : vector<8x96xf32>
    %29 = vector.extract_strided_slice %28 {offsets = [0, 0], sizes = [8, 32], strides = [1, 1]} : vector<8x96xf32> to vector<8x32xf32>
    %c0_15 = arith.constant 0 : index
    %c0_16 = arith.constant 0 : index
    %c0_17 = arith.constant 0 : index
    %30 = vector.load %arg7[%c0_15, %c0_16, %c0_17] : memref<1x8x32xf32, #tpu.memory_space<vmem>>, vector<1x8x32xf32>
    %31 = vector.shape_cast %30 : vector<1x8x32xf32> to vector<8x32xf32>
    %32 = vector.shape_cast %29 : vector<8x32xf32> to vector<1x8x32xf32>
    tpu.vector_store %arg7[%c0_15, %c0_16, %c0_17], %32 {strides = array<i32>} : memref<1x8x32xf32, #tpu.memory_space<vmem>>, vector<1x8x32xf32>,
    %33 = vector.extract_strided_slice %28 {offsets = [0, 32], sizes = [8, 32], strides = [1, 1]} : vector<8x96xf32> to vector<8x32xf32>
    %c0_18 = arith.constant 0 : index
    %c0_19 = arith.constant 0 : index
    %c0_20 = arith.constant 0 : index
    %34 = vector.load %arg8[%c0_18, %c0_19, %c0_20] : memref<1x8x32xf32, #tpu.memory_space<vmem>>, vector<1x8x32xf32>
    %35 = vector.shape_cast %34 : vector<1x8x32xf32> to vector<8x32xf32>
    %36 = vector.shape_cast %33 : vector<8x32xf32> to vector<1x8x32xf32>
    tpu.vector_store %arg8[%c0_18, %c0_19, %c0_20], %36 {strides = array<i32>} : memref<1x8x32xf32, #tpu.memory_space<vmem>>, vector<1x8x32xf32>,
    %37 = vector.extract_strided_slice %28 {offsets = [0, 64], sizes = [8, 32], strides = [1, 1]} : vector<8x96xf32> to vector<8x32xf32>
    %c0_21 = arith.constant 0 : index
    %c0_22 = arith.constant 0 : index
    %c0_23 = arith.constant 0 : index
    %38 = vector.load %arg9[%c0_21, %c0_22, %c0_23] : memref<1x8x32xf32, #tpu.memory_space<vmem>>, vector<1x8x32xf32>
    %39 = vector.shape_cast %38 : vector<1x8x32xf32> to vector<8x32xf32>
    %40 = vector.shape_cast %37 : vector<8x32xf32> to vector<1x8x32xf32>
    tpu.vector_store %arg9[%c0_21, %c0_22, %c0_23], %40 {strides = array<i32>} : memref<1x8x32xf32, #tpu.memory_space<vmem>>, vector<1x8x32xf32>,
    return
  }
  func.func @transform_0(%arg0: i32, %arg1: i32) -> (i32, i32, i32) {
    %c0_i32 = arith.constant 0 : i32
    %c0_i32_0 = arith.constant 0 : i32
    return %arg0, %arg1, %c0_i32 : i32, i32, i32
  }
  func.func @transform_1(%arg0: i32, %arg1: i32) -> (i32, i32) {
    %c0_i32 = arith.constant 0 : i32
    %c0_i32_0 = arith.constant 0 : i32
    %c0_i32_1 = arith.constant 0 : i32
    return %c0_i32, %c0_i32_0 : i32, i32
  }
  func.func @transform_2(%arg0: i32, %arg1: i32) -> (i32, i32) {
    %c0_i32 = arith.constant 0 : i32
    %c0_i32_0 = arith.constant 0 : i32
    %c0_i32_1 = arith.constant 0 : i32
    return %c0_i32, %c0_i32_0 : i32, i32
  }
  func.func @transform_3(%arg0: i32, %arg1: i32) -> (i32, i32) {
    %c0_i32 = arith.constant 0 : i32
    %c0_i32_0 = arith.constant 0 : i32
    %c0_i32_1 = arith.constant 0 : i32
    return %c0_i32, %c0_i32_0 : i32, i32
  }
  func.func @transform_4(%arg0: i32, %arg1: i32) -> (i32, i32) {
    %c0_i32 = arith.constant 0 : i32
    %c0_i32_0 = arith.constant 0 : i32
    %c0_i32_1 = arith.constant 0 : i32
    return %c0_i32, %c0_i32_0 : i32, i32
  }
  func.func @transform_5(%arg0: i32, %arg1: i32) -> (i32, i32, i32) {
    %c0_i32 = arith.constant 0 : i32
    %c0_i32_0 = arith.constant 0 : i32
    return %arg0, %arg1, %c0_i32 : i32, i32, i32
  }
  func.func @transform_6(%arg0: i32, %arg1: i32) -> (i32, i32, i32) {
    %c0_i32 = arith.constant 0 : i32
    %c0_i32_0 = arith.constant 0 : i32
    return %arg0, %arg1, %c0_i32 : i32, i32, i32
  }
  func.func @transform_7(%arg0: i32, %arg1: i32) -> (i32, i32, i32) {
    %c0_i32 = arith.constant 0 : i32
    %c0_i32_0 = arith.constant 0 : i32
    return %arg0, %arg1, %c0_i32 : i32, i32, i32
  }
}

module attributes {stable_mosaic.version = 11 : i64} {
  func.func @_flash_attn_kernel(%arg0: i32, %arg1: i32, %arg2: i32, %arg3: memref<1x8x32xf32, #tpu.memory_space<vmem>>, %arg4: memref<1x8x32xf32, #tpu.memory_space<vmem>>, %arg5: memref<1x8x32xf32, #tpu.memory_space<vmem>>, %arg6: memref<1x8x32xf32, #tpu.memory_space<vmem>>, %arg7: memref<8x4xf32, #tpu.memory_space<vmem>>, %arg8: memref<8x4xf32, #tpu.memory_space<vmem>>, %arg9: memref<8x32xf32, #tpu.memory_space<vmem>>) attributes {dimension_semantics = [#tpu.dimension_semantics<parallel>, #tpu.dimension_semantics<parallel>, #tpu.dimension_semantics<arbitrary>], iteration_bounds = array<i64: 2, 1, 1>, scalar_prefetch = 0 : i64, scratch_operands = 3 : i64, tpu.core_type = #tpu.core_type<tc>, window_params = [{transform_indices = @transform_0, window_bounds = array<i64: 1, 8, 32>}, {transform_indices = @transform_1, window_bounds = array<i64: 1, 8, 32>}, {transform_indices = @transform_2, window_bounds = array<i64: 1, 8, 32>}, {transform_indices = @transform_3, window_bounds = array<i64: 1, 8, 32>}]} {
    %c0_i32 = arith.constant 0 : i32
    %0 = arith.cmpi eq, %arg2, %c0_i32 : i32
    %1 = arith.extui %0 : i1 to i32
    %c0_i32_0 = arith.constant 0 : i32
    %2 = arith.cmpi ne, %1, %c0_i32_0 : i32
    scf.if %2 {
      %cst_72 = arith.constant 0xFF800000 : f32
      %124 = vector.broadcast %cst_72 : f32 to vector<8x4xf32>
      %c0_73 = arith.constant 0 : index
      %c0_74 = arith.constant 0 : index
      %125 = vector.load %arg7[%c0_73, %c0_74] : memref<8x4xf32, #tpu.memory_space<vmem>>, vector<8x4xf32>
      tpu.vector_store %arg7[%c0_73, %c0_74], %124 {strides = array<i32>} : memref<8x4xf32, #tpu.memory_space<vmem>>, vector<8x4xf32>,
      %cst_75 = arith.constant 0.000000e+00 : f32
      %126 = vector.broadcast %cst_75 : f32 to vector<8x4xf32>
      %c0_76 = arith.constant 0 : index
      %c0_77 = arith.constant 0 : index
      %127 = vector.load %arg8[%c0_76, %c0_77] : memref<8x4xf32, #tpu.memory_space<vmem>>, vector<8x4xf32>
      tpu.vector_store %arg8[%c0_76, %c0_77], %126 {strides = array<i32>} : memref<8x4xf32, #tpu.memory_space<vmem>>, vector<8x4xf32>,
      %cst_78 = arith.constant 0.000000e+00 : f32
      %128 = vector.broadcast %cst_78 : f32 to vector<8x32xf32>
      %c0_79 = arith.constant 0 : index
      %c0_80 = arith.constant 0 : index
      %129 = vector.load %arg9[%c0_79, %c0_80] : memref<8x32xf32, #tpu.memory_space<vmem>>, vector<8x32xf32>
      tpu.vector_store %arg9[%c0_79, %c0_80], %128 {strides = array<i32>} : memref<8x32xf32, #tpu.memory_space<vmem>>, vector<8x32xf32>,
    } else {
    }
    %c0 = arith.constant 0 : index
    %c0_1 = arith.constant 0 : index
    %c0_2 = arith.constant 0 : index
    %3 = vector.load %arg3[%c0, %c0_1, %c0_2] : memref<1x8x32xf32, #tpu.memory_space<vmem>>, vector<1x8x32xf32>
    %4 = vector.shape_cast %3 : vector<1x8x32xf32> to vector<8x32xf32>
    %c0_3 = arith.constant 0 : index
    %c0_4 = arith.constant 0 : index
    %c0_5 = arith.constant 0 : index
    %5 = vector.load %arg4[%c0_3, %c0_4, %c0_5] : memref<1x8x32xf32, #tpu.memory_space<vmem>>, vector<1x8x32xf32>
    %6 = vector.shape_cast %5 : vector<1x8x32xf32> to vector<8x32xf32>
    %c0_6 = arith.constant 0 : index
    %c0_7 = arith.constant 0 : index
    %c0_8 = arith.constant 0 : index
    %7 = vector.load %arg5[%c0_6, %c0_7, %c0_8] : memref<1x8x32xf32, #tpu.memory_space<vmem>>, vector<1x8x32xf32>
    %8 = vector.shape_cast %7 : vector<1x8x32xf32> to vector<8x32xf32>
    %9 = vector.extract_strided_slice %4 {offsets = [0, 0], sizes = [8, 8], strides = [1, 1]} : vector<8x32xf32> to vector<8x8xf32>
    %10 = vector.extract_strided_slice %6 {offsets = [0, 0], sizes = [8, 8], strides = [1, 1]} : vector<8x32xf32> to vector<8x8xf32>
    %11 = vector.extract_strided_slice %8 {offsets = [0, 0], sizes = [8, 8], strides = [1, 1]} : vector<8x32xf32> to vector<8x8xf32>
    %cst = arith.constant dense<0.000000e+00> : vector<8x8xf32>
    %12 = tpu.matmul %9, %10, %cst {dimension_numbers = #tpu.dot_dimension_numbers<[1], [1], [0], [0], [0, 0, 1, 0], [], []>} : vector<8x8xf32>, vector<8x8xf32>, vector<8x8xf32> -> vector<8x8xf32>
    %cst_9 = arith.constant 0.353553385 : f32
    %13 = vector.broadcast %cst_9 : f32 to vector<8x8xf32>
    %14 = arith.mulf %12, %13 : vector<8x8xf32>
    %c0_10 = arith.constant 0 : index
    %c0_11 = arith.constant 0 : index
    %15 = vector.load %arg7[%c0_10, %c0_11] : memref<8x4xf32, #tpu.memory_space<vmem>>, vector<8x1xf32>
    %cst_12 = arith.constant dense<0xFF800000> : vector<8xf32>
    %16 = vector.multi_reduction <maximumf>, %14, %cst_12 [1] : vector<8x8xf32> to vector<8xf32>
    %17 = vector.shape_cast %16 : vector<8xf32> to vector<8x1xf32>
    %18 = arith.maximumf %15, %17 : vector<8x1xf32>
    %19 = arith.subf %15, %18 : vector<8x1xf32>
    %20 = math.exp %19 : vector<8x1xf32>
    %21 = vector.broadcast %18 : vector<8x1xf32> to vector<8x8xf32>
    %22 = arith.subf %14, %21 : vector<8x8xf32>
    %23 = math.exp %22 : vector<8x8xf32>
    %c0_13 = arith.constant 0 : index
    %c0_14 = arith.constant 0 : index
    %24 = vector.load %arg8[%c0_13, %c0_14] : memref<8x4xf32, #tpu.memory_space<vmem>>, vector<8x1xf32>
    %25 = arith.mulf %20, %24 : vector<8x1xf32>
    %cst_15 = arith.constant dense<0.000000e+00> : vector<8xf32>
    %26 = vector.multi_reduction <add>, %23, %cst_15 [1] : vector<8x8xf32> to vector<8xf32>
    %27 = vector.shape_cast %26 : vector<8xf32> to vector<8x1xf32>
    %28 = arith.addf %25, %27 : vector<8x1xf32>
    %c0_16 = arith.constant 0 : index
    %c0_17 = arith.constant 0 : index
    %29 = vector.load %arg8[%c0_16, %c0_17] : memref<8x4xf32, #tpu.memory_space<vmem>>, vector<8x1xf32>
    tpu.vector_store %arg8[%c0_16, %c0_17], %28 {strides = array<i32>} : memref<8x4xf32, #tpu.memory_space<vmem>>, vector<8x1xf32>,
    %c0_18 = arith.constant 0 : index
    %c0_19 = arith.constant 0 : index
    %30 = vector.load %arg9[%c0_18, %c0_19] : memref<8x32xf32, #tpu.memory_space<vmem>>, vector<8x8xf32>
    %31 = vector.broadcast %20 : vector<8x1xf32> to vector<8x8xf32>
    %32 = arith.mulf %31, %30 : vector<8x8xf32>
    %cst_20 = arith.constant dense<0.000000e+00> : vector<8x8xf32>
    %33 = tpu.matmul %23, %11, %cst_20 {dimension_numbers = #tpu.dot_dimension_numbers<[1], [0], [0], [1], [0, 0, 1, 1], [], []>} : vector<8x8xf32>, vector<8x8xf32>, vector<8x8xf32> -> vector<8x8xf32>
    %34 = arith.addf %32, %33 : vector<8x8xf32>
    %c0_21 = arith.constant 0 : index
    %c0_22 = arith.constant 0 : index
    %35 = vector.load %arg9[%c0_21, %c0_22] : memref<8x32xf32, #tpu.memory_space<vmem>>, vector<8x8xf32>
    tpu.vector_store %arg9[%c0_21, %c0_22], %34 {strides = array<i32>} : memref<8x32xf32, #tpu.memory_space<vmem>>, vector<8x8xf32>,
    %c0_23 = arith.constant 0 : index
    %c0_24 = arith.constant 0 : index
    %36 = vector.load %arg7[%c0_23, %c0_24] : memref<8x4xf32, #tpu.memory_space<vmem>>, vector<8x1xf32>
    tpu.vector_store %arg7[%c0_23, %c0_24], %18 {strides = array<i32>} : memref<8x4xf32, #tpu.memory_space<vmem>>, vector<8x1xf32>,
    %37 = vector.extract_strided_slice %4 {offsets = [0, 8], sizes = [8, 8], strides = [1, 1]} : vector<8x32xf32> to vector<8x8xf32>
    %38 = vector.extract_strided_slice %6 {offsets = [0, 8], sizes = [8, 8], strides = [1, 1]} : vector<8x32xf32> to vector<8x8xf32>
    %39 = vector.extract_strided_slice %8 {offsets = [0, 8], sizes = [8, 8], strides = [1, 1]} : vector<8x32xf32> to vector<8x8xf32>
    %cst_25 = arith.constant dense<0.000000e+00> : vector<8x8xf32>
    %40 = tpu.matmul %37, %38, %cst_25 {dimension_numbers = #tpu.dot_dimension_numbers<[1], [1], [0], [0], [0, 0, 1, 0], [], []>} : vector<8x8xf32>, vector<8x8xf32>, vector<8x8xf32> -> vector<8x8xf32>
    %cst_26 = arith.constant 0.353553385 : f32
    %41 = vector.broadcast %cst_26 : f32 to vector<8x8xf32>
    %42 = arith.mulf %40, %41 : vector<8x8xf32>
    %c0_27 = arith.constant 0 : index
    %c1 = arith.constant 1 : index
    %43 = vector.load %arg7[%c0_27, %c1] : memref<8x4xf32, #tpu.memory_space<vmem>>, vector<8x1xf32>
    %cst_28 = arith.constant dense<0xFF800000> : vector<8xf32>
    %44 = vector.multi_reduction <maximumf>, %42, %cst_28 [1] : vector<8x8xf32> to vector<8xf32>
    %45 = vector.shape_cast %44 : vector<8xf32> to vector<8x1xf32>
    %46 = arith.maximumf %43, %45 : vector<8x1xf32>
    %47 = arith.subf %43, %46 : vector<8x1xf32>
    %48 = math.exp %47 : vector<8x1xf32>
    %49 = vector.broadcast %46 : vector<8x1xf32> to vector<8x8xf32>
    %50 = arith.subf %42, %49 : vector<8x8xf32>
    %51 = math.exp %50 : vector<8x8xf32>
    %c0_29 = arith.constant 0 : index
    %c1_30 = arith.constant 1 : index
    %52 = vector.load %arg8[%c0_29, %c1_30] : memref<8x4xf32, #tpu.memory_space<vmem>>, vector<8x1xf32>
    %53 = arith.mulf %48, %52 : vector<8x1xf32>
    %cst_31 = arith.constant dense<0.000000e+00> : vector<8xf32>
    %54 = vector.multi_reduction <add>, %51, %cst_31 [1] : vector<8x8xf32> to vector<8xf32>
    %55 = vector.shape_cast %54 : vector<8xf32> to vector<8x1xf32>
    %56 = arith.addf %53, %55 : vector<8x1xf32>
    %c0_32 = arith.constant 0 : index
    %c1_33 = arith.constant 1 : index
    %57 = vector.load %arg8[%c0_32, %c1_33] : memref<8x4xf32, #tpu.memory_space<vmem>>, vector<8x1xf32>
    tpu.vector_store %arg8[%c0_32, %c1_33], %56 {strides = array<i32>} : memref<8x4xf32, #tpu.memory_space<vmem>>, vector<8x1xf32>,
    %c0_34 = arith.constant 0 : index
    %c8 = arith.constant 8 : index
    %58 = vector.load %arg9[%c0_34, %c8] : memref<8x32xf32, #tpu.memory_space<vmem>>, vector<8x8xf32>
    %59 = vector.broadcast %48 : vector<8x1xf32> to vector<8x8xf32>
    %60 = arith.mulf %59, %58 : vector<8x8xf32>
    %cst_35 = arith.constant dense<0.000000e+00> : vector<8x8xf32>
    %61 = tpu.matmul %51, %39, %cst_35 {dimension_numbers = #tpu.dot_dimension_numbers<[1], [0], [0], [1], [0, 0, 1, 1], [], []>} : vector<8x8xf32>, vector<8x8xf32>, vector<8x8xf32> -> vector<8x8xf32>
    %62 = arith.addf %60, %61 : vector<8x8xf32>
    %c0_36 = arith.constant 0 : index
    %c8_37 = arith.constant 8 : index
    %63 = vector.load %arg9[%c0_36, %c8_37] : memref<8x32xf32, #tpu.memory_space<vmem>>, vector<8x8xf32>
    tpu.vector_store %arg9[%c0_36, %c8_37], %62 {strides = array<i32>} : memref<8x32xf32, #tpu.memory_space<vmem>>, vector<8x8xf32>,
    %c0_38 = arith.constant 0 : index
    %c1_39 = arith.constant 1 : index
    %64 = vector.load %arg7[%c0_38, %c1_39] : memref<8x4xf32, #tpu.memory_space<vmem>>, vector<8x1xf32>
    tpu.vector_store %arg7[%c0_38, %c1_39], %46 {strides = array<i32>} : memref<8x4xf32, #tpu.memory_space<vmem>>, vector<8x1xf32>,
    %65 = vector.extract_strided_slice %4 {offsets = [0, 16], sizes = [8, 8], strides = [1, 1]} : vector<8x32xf32> to vector<8x8xf32>
    %66 = vector.extract_strided_slice %6 {offsets = [0, 16], sizes = [8, 8], strides = [1, 1]} : vector<8x32xf32> to vector<8x8xf32>
    %67 = vector.extract_strided_slice %8 {offsets = [0, 16], sizes = [8, 8], strides = [1, 1]} : vector<8x32xf32> to vector<8x8xf32>
    %cst_40 = arith.constant dense<0.000000e+00> : vector<8x8xf32>
    %68 = tpu.matmul %65, %66, %cst_40 {dimension_numbers = #tpu.dot_dimension_numbers<[1], [1], [0], [0], [0, 0, 1, 0], [], []>} : vector<8x8xf32>, vector<8x8xf32>, vector<8x8xf32> -> vector<8x8xf32>
    %cst_41 = arith.constant 0.353553385 : f32
    %69 = vector.broadcast %cst_41 : f32 to vector<8x8xf32>
    %70 = arith.mulf %68, %69 : vector<8x8xf32>
    %c0_42 = arith.constant 0 : index
    %c2 = arith.constant 2 : index
    %71 = vector.load %arg7[%c0_42, %c2] : memref<8x4xf32, #tpu.memory_space<vmem>>, vector<8x1xf32>
    %cst_43 = arith.constant dense<0xFF800000> : vector<8xf32>
    %72 = vector.multi_reduction <maximumf>, %70, %cst_43 [1] : vector<8x8xf32> to vector<8xf32>
    %73 = vector.shape_cast %72 : vector<8xf32> to vector<8x1xf32>
    %74 = arith.maximumf %71, %73 : vector<8x1xf32>
    %75 = arith.subf %71, %74 : vector<8x1xf32>
    %76 = math.exp %75 : vector<8x1xf32>
    %77 = vector.broadcast %74 : vector<8x1xf32> to vector<8x8xf32>
    %78 = arith.subf %70, %77 : vector<8x8xf32>
    %79 = math.exp %78 : vector<8x8xf32>
    %c0_44 = arith.constant 0 : index
    %c2_45 = arith.constant 2 : index
    %80 = vector.load %arg8[%c0_44, %c2_45] : memref<8x4xf32, #tpu.memory_space<vmem>>, vector<8x1xf32>
    %81 = arith.mulf %76, %80 : vector<8x1xf32>
    %cst_46 = arith.constant dense<0.000000e+00> : vector<8xf32>
    %82 = vector.multi_reduction <add>, %79, %cst_46 [1] : vector<8x8xf32> to vector<8xf32>
    %83 = vector.shape_cast %82 : vector<8xf32> to vector<8x1xf32>
    %84 = arith.addf %81, %83 : vector<8x1xf32>
    %c0_47 = arith.constant 0 : index
    %c2_48 = arith.constant 2 : index
    %85 = vector.load %arg8[%c0_47, %c2_48] : memref<8x4xf32, #tpu.memory_space<vmem>>, vector<8x1xf32>
    tpu.vector_store %arg8[%c0_47, %c2_48], %84 {strides = array<i32>} : memref<8x4xf32, #tpu.memory_space<vmem>>, vector<8x1xf32>,
    %c0_49 = arith.constant 0 : index
    %c16 = arith.constant 16 : index
    %86 = vector.load %arg9[%c0_49, %c16] : memref<8x32xf32, #tpu.memory_space<vmem>>, vector<8x8xf32>
    %87 = vector.broadcast %76 : vector<8x1xf32> to vector<8x8xf32>
    %88 = arith.mulf %87, %86 : vector<8x8xf32>
    %cst_50 = arith.constant dense<0.000000e+00> : vector<8x8xf32>
    %89 = tpu.matmul %79, %67, %cst_50 {dimension_numbers = #tpu.dot_dimension_numbers<[1], [0], [0], [1], [0, 0, 1, 1], [], []>} : vector<8x8xf32>, vector<8x8xf32>, vector<8x8xf32> -> vector<8x8xf32>
    %90 = arith.addf %88, %89 : vector<8x8xf32>
    %c0_51 = arith.constant 0 : index
    %c16_52 = arith.constant 16 : index
    %91 = vector.load %arg9[%c0_51, %c16_52] : memref<8x32xf32, #tpu.memory_space<vmem>>, vector<8x8xf32>
    tpu.vector_store %arg9[%c0_51, %c16_52], %90 {strides = array<i32>} : memref<8x32xf32, #tpu.memory_space<vmem>>, vector<8x8xf32>,
    %c0_53 = arith.constant 0 : index
    %c2_54 = arith.constant 2 : index
    %92 = vector.load %arg7[%c0_53, %c2_54] : memref<8x4xf32, #tpu.memory_space<vmem>>, vector<8x1xf32>
    tpu.vector_store %arg7[%c0_53, %c2_54], %74 {strides = array<i32>} : memref<8x4xf32, #tpu.memory_space<vmem>>, vector<8x1xf32>,
    %93 = vector.extract_strided_slice %4 {offsets = [0, 24], sizes = [8, 8], strides = [1, 1]} : vector<8x32xf32> to vector<8x8xf32>
    %94 = vector.extract_strided_slice %6 {offsets = [0, 24], sizes = [8, 8], strides = [1, 1]} : vector<8x32xf32> to vector<8x8xf32>
    %95 = vector.extract_strided_slice %8 {offsets = [0, 24], sizes = [8, 8], strides = [1, 1]} : vector<8x32xf32> to vector<8x8xf32>
    %cst_55 = arith.constant dense<0.000000e+00> : vector<8x8xf32>
    %96 = tpu.matmul %93, %94, %cst_55 {dimension_numbers = #tpu.dot_dimension_numbers<[1], [1], [0], [0], [0, 0, 1, 0], [], []>} : vector<8x8xf32>, vector<8x8xf32>, vector<8x8xf32> -> vector<8x8xf32>
    %cst_56 = arith.constant 0.353553385 : f32
    %97 = vector.broadcast %cst_56 : f32 to vector<8x8xf32>
    %98 = arith.mulf %96, %97 : vector<8x8xf32>
    %c0_57 = arith.constant 0 : index
    %c3 = arith.constant 3 : index
    %99 = vector.load %arg7[%c0_57, %c3] : memref<8x4xf32, #tpu.memory_space<vmem>>, vector<8x1xf32>
    %cst_58 = arith.constant dense<0xFF800000> : vector<8xf32>
    %100 = vector.multi_reduction <maximumf>, %98, %cst_58 [1] : vector<8x8xf32> to vector<8xf32>
    %101 = vector.shape_cast %100 : vector<8xf32> to vector<8x1xf32>
    %102 = arith.maximumf %99, %101 : vector<8x1xf32>
    %103 = arith.subf %99, %102 : vector<8x1xf32>
    %104 = math.exp %103 : vector<8x1xf32>
    %105 = vector.broadcast %102 : vector<8x1xf32> to vector<8x8xf32>
    %106 = arith.subf %98, %105 : vector<8x8xf32>
    %107 = math.exp %106 : vector<8x8xf32>
    %c0_59 = arith.constant 0 : index
    %c3_60 = arith.constant 3 : index
    %108 = vector.load %arg8[%c0_59, %c3_60] : memref<8x4xf32, #tpu.memory_space<vmem>>, vector<8x1xf32>
    %109 = arith.mulf %104, %108 : vector<8x1xf32>
    %cst_61 = arith.constant dense<0.000000e+00> : vector<8xf32>
    %110 = vector.multi_reduction <add>, %107, %cst_61 [1] : vector<8x8xf32> to vector<8xf32>
    %111 = vector.shape_cast %110 : vector<8xf32> to vector<8x1xf32>
    %112 = arith.addf %109, %111 : vector<8x1xf32>
    %c0_62 = arith.constant 0 : index
    %c3_63 = arith.constant 3 : index
    %113 = vector.load %arg8[%c0_62, %c3_63] : memref<8x4xf32, #tpu.memory_space<vmem>>, vector<8x1xf32>
    tpu.vector_store %arg8[%c0_62, %c3_63], %112 {strides = array<i32>} : memref<8x4xf32, #tpu.memory_space<vmem>>, vector<8x1xf32>,
    %c0_64 = arith.constant 0 : index
    %c24 = arith.constant 24 : index
    %114 = vector.load %arg9[%c0_64, %c24] : memref<8x32xf32, #tpu.memory_space<vmem>>, vector<8x8xf32>
    %115 = vector.broadcast %104 : vector<8x1xf32> to vector<8x8xf32>
    %116 = arith.mulf %115, %114 : vector<8x8xf32>
    %cst_65 = arith.constant dense<0.000000e+00> : vector<8x8xf32>
    %117 = tpu.matmul %107, %95, %cst_65 {dimension_numbers = #tpu.dot_dimension_numbers<[1], [0], [0], [1], [0, 0, 1, 1], [], []>} : vector<8x8xf32>, vector<8x8xf32>, vector<8x8xf32> -> vector<8x8xf32>
    %118 = arith.addf %116, %117 : vector<8x8xf32>
    %c0_66 = arith.constant 0 : index
    %c24_67 = arith.constant 24 : index
    %119 = vector.load %arg9[%c0_66, %c24_67] : memref<8x32xf32, #tpu.memory_space<vmem>>, vector<8x8xf32>
    tpu.vector_store %arg9[%c0_66, %c24_67], %118 {strides = array<i32>} : memref<8x32xf32, #tpu.memory_space<vmem>>, vector<8x8xf32>,
    %c0_68 = arith.constant 0 : index
    %c3_69 = arith.constant 3 : index
    %120 = vector.load %arg7[%c0_68, %c3_69] : memref<8x4xf32, #tpu.memory_space<vmem>>, vector<8x1xf32>
    tpu.vector_store %arg7[%c0_68, %c3_69], %102 {strides = array<i32>} : memref<8x4xf32, #tpu.memory_space<vmem>>, vector<8x1xf32>,
    %c0_i32_70 = arith.constant 0 : i32
    %121 = arith.cmpi eq, %arg2, %c0_i32_70 : i32
    %122 = arith.extui %121 : i1 to i32
    %c0_i32_71 = arith.constant 0 : i32
    %123 = arith.cmpi ne, %122, %c0_i32_71 : i32
    scf.if %123 {
      %c0_72 = arith.constant 0 : index
      %c0_73 = arith.constant 0 : index
      %124 = vector.load %arg8[%c0_72, %c0_73] : memref<8x4xf32, #tpu.memory_space<vmem>>, vector<8x1xf32>
      %125 = tpu.reciprocal %124 : vector<8x1xf32> -> vector<8x1xf32>
      %c0_74 = arith.constant 0 : index
      %c0_75 = arith.constant 0 : index
      %126 = vector.load %arg9[%c0_74, %c0_75] : memref<8x32xf32, #tpu.memory_space<vmem>>, vector<8x8xf32>
      %127 = vector.broadcast %125 : vector<8x1xf32> to vector<8x8xf32>
      %128 = arith.mulf %126, %127 : vector<8x8xf32>
      %c0_76 = arith.constant 0 : index
      %c1_77 = arith.constant 1 : index
      %129 = vector.load %arg8[%c0_76, %c1_77] : memref<8x4xf32, #tpu.memory_space<vmem>>, vector<8x1xf32>
      %130 = tpu.reciprocal %129 : vector<8x1xf32> -> vector<8x1xf32>
      %c0_78 = arith.constant 0 : index
      %c8_79 = arith.constant 8 : index
      %131 = vector.load %arg9[%c0_78, %c8_79] : memref<8x32xf32, #tpu.memory_space<vmem>>, vector<8x8xf32>
      %132 = vector.broadcast %130 : vector<8x1xf32> to vector<8x8xf32>
      %133 = arith.mulf %131, %132 : vector<8x8xf32>
      %c0_80 = arith.constant 0 : index
      %c2_81 = arith.constant 2 : index
      %134 = vector.load %arg8[%c0_80, %c2_81] : memref<8x4xf32, #tpu.memory_space<vmem>>, vector<8x1xf32>
      %135 = tpu.reciprocal %134 : vector<8x1xf32> -> vector<8x1xf32>
      %c0_82 = arith.constant 0 : index
      %c16_83 = arith.constant 16 : index
      %136 = vector.load %arg9[%c0_82, %c16_83] : memref<8x32xf32, #tpu.memory_space<vmem>>, vector<8x8xf32>
      %137 = vector.broadcast %135 : vector<8x1xf32> to vector<8x8xf32>
      %138 = arith.mulf %136, %137 : vector<8x8xf32>
      %c0_84 = arith.constant 0 : index
      %c3_85 = arith.constant 3 : index
      %139 = vector.load %arg8[%c0_84, %c3_85] : memref<8x4xf32, #tpu.memory_space<vmem>>, vector<8x1xf32>
      %140 = tpu.reciprocal %139 : vector<8x1xf32> -> vector<8x1xf32>
      %c0_86 = arith.constant 0 : index
      %c24_87 = arith.constant 24 : index
      %141 = vector.load %arg9[%c0_86, %c24_87] : memref<8x32xf32, #tpu.memory_space<vmem>>, vector<8x8xf32>
      %142 = vector.broadcast %140 : vector<8x1xf32> to vector<8x8xf32>
      %143 = arith.mulf %141, %142 : vector<8x8xf32>
      %144 = tpu.concatenate %128, %133, %138, %143 in 1 : vector<8x8xf32>, vector<8x8xf32>, vector<8x8xf32>, vector<8x8xf32> -> vector<8x32xf32>
      %c0_88 = arith.constant 0 : index
      %c0_89 = arith.constant 0 : index
      %c0_90 = arith.constant 0 : index
      %145 = vector.load %arg6[%c0_88, %c0_89, %c0_90] : memref<1x8x32xf32, #tpu.memory_space<vmem>>, vector<1x8x32xf32>
      %146 = vector.shape_cast %145 : vector<1x8x32xf32> to vector<8x32xf32>
      %147 = vector.shape_cast %144 : vector<8x32xf32> to vector<1x8x32xf32>
      tpu.vector_store %arg6[%c0_88, %c0_89, %c0_90], %147 {strides = array<i32>} : memref<1x8x32xf32, #tpu.memory_space<vmem>>, vector<1x8x32xf32>,
    } else {
    }
    return
  }
  func.func @transform_0(%arg0: i32, %arg1: i32, %arg2: i32) -> (i32, i32, i32) {
    %c0_i32 = arith.constant 0 : i32
    %c0_i32_0 = arith.constant 0 : i32
    return %arg0, %arg1, %c0_i32 : i32, i32, i32
  }
  func.func @transform_1(%arg0: i32, %arg1: i32, %arg2: i32) -> (i32, i32, i32) {
    %c0_i32 = arith.constant 0 : i32
    %c0_i32_0 = arith.constant 0 : i32
    return %arg0, %arg2, %c0_i32 : i32, i32, i32
  }
  func.func @transform_2(%arg0: i32, %arg1: i32, %arg2: i32) -> (i32, i32, i32) {
    %c0_i32 = arith.constant 0 : i32
    %c0_i32_0 = arith.constant 0 : i32
    return %arg0, %arg2, %c0_i32 : i32, i32, i32
  }
  func.func @transform_3(%arg0: i32, %arg1: i32, %arg2: i32) -> (i32, i32, i32) {
    %c0_i32 = arith.constant 0 : i32
    %c0_i32_0 = arith.constant 0 : i32
    return %arg0, %arg1, %c0_i32 : i32, i32, i32
  }
}

module attributes {stable_mosaic.version = 11 : i64} {
  func.func @_outproj_ffn_kernel(%arg0: i32, %arg1: i32, %arg2: memref<1x8x32xf32, #tpu.memory_space<vmem>>, %arg3: memref<1x8x32xf32, #tpu.memory_space<vmem>>, %arg4: memref<32x32xf32, #tpu.memory_space<vmem>>, %arg5: memref<1x32xf32, #tpu.memory_space<vmem>>, %arg6: memref<1x32xf32, #tpu.memory_space<vmem>>, %arg7: memref<1x32xf32, #tpu.memory_space<vmem>>, %arg8: memref<32x64xf32, #tpu.memory_space<vmem>>, %arg9: memref<1x64xf32, #tpu.memory_space<vmem>>, %arg10: memref<64x32xf32, #tpu.memory_space<vmem>>, %arg11: memref<1x32xf32, #tpu.memory_space<vmem>>, %arg12: memref<1x8x32xf32, #tpu.memory_space<vmem>>) attributes {dimension_semantics = [#tpu.dimension_semantics<parallel>, #tpu.dimension_semantics<parallel>], iteration_bounds = array<i64: 2, 1>, scalar_prefetch = 0 : i64, scratch_operands = 0 : i64, tpu.core_type = #tpu.core_type<tc>, window_params = [{transform_indices = @transform_0, window_bounds = array<i64: 1, 8, 32>}, {transform_indices = @transform_1, window_bounds = array<i64: 1, 8, 32>}, {pipeline_mode = #tpu.pipeline_mode<synchronous>, transform_indices = @transform_2, window_bounds = array<i64: 32, 32>}, {pipeline_mode = #tpu.pipeline_mode<synchronous>, transform_indices = @transform_3, window_bounds = array<i64: 1, 32>}, {pipeline_mode = #tpu.pipeline_mode<synchronous>, transform_indices = @transform_4, window_bounds = array<i64: 1, 32>}, {pipeline_mode = #tpu.pipeline_mode<synchronous>, transform_indices = @transform_5, window_bounds = array<i64: 1, 32>}, {pipeline_mode = #tpu.pipeline_mode<synchronous>, transform_indices = @transform_6, window_bounds = array<i64: 32, 64>}, {pipeline_mode = #tpu.pipeline_mode<synchronous>, transform_indices = @transform_7, window_bounds = array<i64: 1, 64>}, {pipeline_mode = #tpu.pipeline_mode<synchronous>, transform_indices = @transform_8, window_bounds = array<i64: 64, 32>}, {pipeline_mode = #tpu.pipeline_mode<synchronous>, transform_indices = @transform_9, window_bounds = array<i64: 1, 32>}, {transform_indices = @transform_10, window_bounds = array<i64: 1, 8, 32>}]} {
    %c0 = arith.constant 0 : index
    %c0_0 = arith.constant 0 : index
    %c0_1 = arith.constant 0 : index
    %0 = vector.load %arg2[%c0, %c0_0, %c0_1] : memref<1x8x32xf32, #tpu.memory_space<vmem>>, vector<1x8x32xf32>
    %1 = vector.shape_cast %0 : vector<1x8x32xf32> to vector<8x32xf32>
    %c0_2 = arith.constant 0 : index
    %c0_3 = arith.constant 0 : index
    %2 = vector.load %arg4[%c0_2, %c0_3] : memref<32x32xf32, #tpu.memory_space<vmem>>, vector<32x32xf32>
    %cst = arith.constant dense<0.000000e+00> : vector<8x32xf32>
    %3 = tpu.matmul %1, %2, %cst {dimension_numbers = #tpu.dot_dimension_numbers<[1], [0], [0], [1], [0, 0, 1, 1], [], []>} : vector<8x32xf32>, vector<32x32xf32>, vector<8x32xf32> -> vector<8x32xf32>
    %c0_4 = arith.constant 0 : index
    %c0_5 = arith.constant 0 : index
    %4 = vector.load %arg5[%c0_4, %c0_5] : memref<1x32xf32, #tpu.memory_space<vmem>>, vector<1x32xf32>
    %5 = vector.broadcast %4 : vector<1x32xf32> to vector<8x32xf32>
    %6 = arith.addf %3, %5 : vector<8x32xf32>
    %c0_6 = arith.constant 0 : index
    %c0_7 = arith.constant 0 : index
    %c0_8 = arith.constant 0 : index
    %7 = vector.load %arg3[%c0_6, %c0_7, %c0_8] : memref<1x8x32xf32, #tpu.memory_space<vmem>>, vector<1x8x32xf32>
    %8 = vector.shape_cast %7 : vector<1x8x32xf32> to vector<8x32xf32>
    %9 = arith.addf %6, %8 : vector<8x32xf32>
    %cst_9 = arith.constant dense<0.000000e+00> : vector<8xf32>
    %10 = vector.multi_reduction <add>, %9, %cst_9 [1] : vector<8x32xf32> to vector<8xf32>
    %11 = vector.shape_cast %10 : vector<8xf32> to vector<8x1xf32>
    %cst_10 = arith.constant 3.200000e+01 : f32
    %12 = vector.broadcast %cst_10 : f32 to vector<8x1xf32>
    %13 = arith.divf %11, %12 : vector<8x1xf32>
    %14 = vector.broadcast %13 : vector<8x1xf32> to vector<8x32xf32>
    %15 = arith.subf %9, %14 : vector<8x32xf32>
    %16 = arith.mulf %15, %15 : vector<8x32xf32>
    %cst_11 = arith.constant dense<0.000000e+00> : vector<8xf32>
    %17 = vector.multi_reduction <add>, %16, %cst_11 [1] : vector<8x32xf32> to vector<8xf32>
    %18 = vector.shape_cast %17 : vector<8xf32> to vector<8x1xf32>
    %cst_12 = arith.constant 3.200000e+01 : f32
    %19 = vector.broadcast %cst_12 : f32 to vector<8x1xf32>
    %20 = arith.divf %18, %19 : vector<8x1xf32>
    %cst_13 = arith.constant 9.99999974E-6 : f32
    %21 = vector.broadcast %cst_13 : f32 to vector<8x1xf32>
    %22 = arith.addf %20, %21 : vector<8x1xf32>
    %23 = math.rsqrt %22 : vector<8x1xf32>
    %24 = vector.broadcast %23 : vector<8x1xf32> to vector<8x32xf32>
    %25 = arith.mulf %15, %24 : vector<8x32xf32>
    %c0_14 = arith.constant 0 : index
    %c0_15 = arith.constant 0 : index
    %26 = vector.load %arg6[%c0_14, %c0_15] : memref<1x32xf32, #tpu.memory_space<vmem>>, vector<1x32xf32>
    %27 = vector.broadcast %26 : vector<1x32xf32> to vector<8x32xf32>
    %28 = arith.mulf %25, %27 : vector<8x32xf32>
    %c0_16 = arith.constant 0 : index
    %c0_17 = arith.constant 0 : index
    %29 = vector.load %arg7[%c0_16, %c0_17] : memref<1x32xf32, #tpu.memory_space<vmem>>, vector<1x32xf32>
    %30 = vector.broadcast %29 : vector<1x32xf32> to vector<8x32xf32>
    %31 = arith.addf %28, %30 : vector<8x32xf32>
    %c0_18 = arith.constant 0 : index
    %c0_19 = arith.constant 0 : index
    %32 = vector.load %arg8[%c0_18, %c0_19] : memref<32x64xf32, #tpu.memory_space<vmem>>, vector<32x64xf32>
    %cst_20 = arith.constant dense<0.000000e+00> : vector<8x64xf32>
    %33 = tpu.matmul %31, %32, %cst_20 {dimension_numbers = #tpu.dot_dimension_numbers<[1], [0], [0], [1], [0, 0, 1, 1], [], []>} : vector<8x32xf32>, vector<32x64xf32>, vector<8x64xf32> -> vector<8x64xf32>
    %c0_21 = arith.constant 0 : index
    %c0_22 = arith.constant 0 : index
    %34 = vector.load %arg9[%c0_21, %c0_22] : memref<1x64xf32, #tpu.memory_space<vmem>>, vector<1x64xf32>
    %35 = vector.broadcast %34 : vector<1x64xf32> to vector<8x64xf32>
    %36 = arith.addf %33, %35 : vector<8x64xf32>
    %cst_23 = arith.constant 0.000000e+00 : f32
    %37 = vector.broadcast %cst_23 : f32 to vector<8x64xf32>
    %38 = arith.maximumf %36, %37 : vector<8x64xf32>
    %c0_24 = arith.constant 0 : index
    %c0_25 = arith.constant 0 : index
    %39 = vector.load %arg10[%c0_24, %c0_25] : memref<64x32xf32, #tpu.memory_space<vmem>>, vector<64x32xf32>
    %cst_26 = arith.constant dense<0.000000e+00> : vector<8x32xf32>
    %40 = tpu.matmul %38, %39, %cst_26 {dimension_numbers = #tpu.dot_dimension_numbers<[1], [0], [0], [1], [0, 0, 1, 1], [], []>} : vector<8x64xf32>, vector<64x32xf32>, vector<8x32xf32> -> vector<8x32xf32>
    %c0_27 = arith.constant 0 : index
    %c0_28 = arith.constant 0 : index
    %41 = vector.load %arg11[%c0_27, %c0_28] : memref<1x32xf32, #tpu.memory_space<vmem>>, vector<1x32xf32>
    %42 = vector.broadcast %41 : vector<1x32xf32> to vector<8x32xf32>
    %43 = arith.addf %40, %42 : vector<8x32xf32>
    %44 = arith.addf %43, %9 : vector<8x32xf32>
    %c0_29 = arith.constant 0 : index
    %c0_30 = arith.constant 0 : index
    %c0_31 = arith.constant 0 : index
    %45 = vector.load %arg12[%c0_29, %c0_30, %c0_31] : memref<1x8x32xf32, #tpu.memory_space<vmem>>, vector<1x8x32xf32>
    %46 = vector.shape_cast %45 : vector<1x8x32xf32> to vector<8x32xf32>
    %47 = vector.shape_cast %44 : vector<8x32xf32> to vector<1x8x32xf32>
    tpu.vector_store %arg12[%c0_29, %c0_30, %c0_31], %47 {strides = array<i32>} : memref<1x8x32xf32, #tpu.memory_space<vmem>>, vector<1x8x32xf32>,
    return
  }
  func.func @transform_0(%arg0: i32, %arg1: i32) -> (i32, i32, i32) {
    %c0_i32 = arith.constant 0 : i32
    %c0_i32_0 = arith.constant 0 : i32
    return %arg0, %arg1, %c0_i32 : i32, i32, i32
  }
  func.func @transform_1(%arg0: i32, %arg1: i32) -> (i32, i32, i32) {
    %c0_i32 = arith.constant 0 : i32
    %c0_i32_0 = arith.constant 0 : i32
    return %arg0, %arg1, %c0_i32 : i32, i32, i32
  }
  func.func @transform_2(%arg0: i32, %arg1: i32) -> (i32, i32) {
    %c0_i32 = arith.constant 0 : i32
    %c0_i32_0 = arith.constant 0 : i32
    %c0_i32_1 = arith.constant 0 : i32
    return %c0_i32, %c0_i32_0 : i32, i32
  }
  func.func @transform_3(%arg0: i32, %arg1: i32) -> (i32, i32) {
    %c0_i32 = arith.constant 0 : i32
    %c0_i32_0 = arith.constant 0 : i32
    %c0_i32_1 = arith.constant 0 : i32
    return %c0_i32, %c0_i32_0 : i32, i32
  }
  func.func @transform_4(%arg0: i32, %arg1: i32) -> (i32, i32) {
    %c0_i32 = arith.constant 0 : i32
    %c0_i32_0 = arith.constant 0 : i32
    %c0_i32_1 = arith.constant 0 : i32
    return %c0_i32, %c0_i32_0 : i32, i32
  }
  func.func @transform_5(%arg0: i32, %arg1: i32) -> (i32, i32) {
    %c0_i32 = arith.constant 0 : i32
    %c0_i32_0 = arith.constant 0 : i32
    %c0_i32_1 = arith.constant 0 : i32
    return %c0_i32, %c0_i32_0 : i32, i32
  }
  func.func @transform_6(%arg0: i32, %arg1: i32) -> (i32, i32) {
    %c0_i32 = arith.constant 0 : i32
    %c0_i32_0 = arith.constant 0 : i32
    %c0_i32_1 = arith.constant 0 : i32
    return %c0_i32, %c0_i32_0 : i32, i32
  }
  func.func @transform_7(%arg0: i32, %arg1: i32) -> (i32, i32) {
    %c0_i32 = arith.constant 0 : i32
    %c0_i32_0 = arith.constant 0 : i32
    %c0_i32_1 = arith.constant 0 : i32
    return %c0_i32, %c0_i32_0 : i32, i32
  }
  func.func @transform_8(%arg0: i32, %arg1: i32) -> (i32, i32) {
    %c0_i32 = arith.constant 0 : i32
    %c0_i32_0 = arith.constant 0 : i32
    %c0_i32_1 = arith.constant 0 : i32
    return %c0_i32, %c0_i32_0 : i32, i32
  }
  func.func @transform_9(%arg0: i32, %arg1: i32) -> (i32, i32) {
    %c0_i32 = arith.constant 0 : i32
    %c0_i32_0 = arith.constant 0 : i32
    %c0_i32_1 = arith.constant 0 : i32
    return %c0_i32, %c0_i32_0 : i32, i32
  }
  func.func @transform_10(%arg0: i32, %arg1: i32) -> (i32, i32, i32) {
    %c0_i32 = arith.constant 0 : i32
    %c0_i32_0 = arith.constant 0 : i32
    return %arg0, %arg1, %c0_i32 : i32, i32, i32
  }
}

</mosaic_0001>

<bundles_post_ra>
// kernel: decoder_layer.4
= control target key start
LH: loop header
LB: loop body
LE: loop exit
PB: predicated region body
PF: predicated region fallthrough
CT: control target
= control target key end

     0   :  { %s940_s12 = smov 0   ;;  %s942_s13 = smov 0   ;;  %s1067_s0 = inlined_call_operand.vmem [shape: f32[2,8,32], index: 0, kind: input, shape index: {}]   ;;  %s1068_s1 = inlined_call_operand.vmem [shape: f32[2,8,32], index: 1, kind: input, shape index: {}]   ;;  %s1069_s2 = inlined_call_operand.vmem [shape: f32[2,8,32], index: 2, kind: input, shape index: {}]   ;;  %s1070_s3 = inlined_call_operand.vmem [shape: f32[2,8,32], index: 3, kind: output, shape index: {}]  }
   0x1   :  { %s944_s14 = smov 0  }
   0x2 LB: > { %s32_s15 = sadd.s32 1, %s902_s13  ;;  %p798_p0 = scmp.ge.s32.totalorder %s906_s14, 1  ;;  %s906_s14 = sphi %s944_s14, %s13_s14   ;;  %s902_s13 = sphi %s942_s13, %s1072_s13   ;;  %s898_s12 = sphi %s940_s12, %s1071_s12  }
   0x3   : > { %p34_p1 = scmp.ge.s32.totalorder %s32_s15, 2  ;;  %p190_p2 = scmp.lt.s32.totalorder %s906_s14, 3 }
   0x5   : > { %s1074_s15 = smov (%p34_p1, %s32_s15), 0  ;;  %p191_p3 = pnand %p798_p0, %p190_p2 }
   0x6   : > { %p232_p4 = scmp.lt.s32.totalorder (!%p191_p3), %s898_s12, 1  ;;  %s909_s23 = smov (!%p191_p3), 112  }
   0x7   : > { %194 = sbr.rel (%p191_p3) target bundleno = 1209 (0x4b9), region = 32  ;;  %s910_s24 = smov (!%p191_p3), 120  }
   0x8   : > { %s911_s25 = smov (!%p191_p3), 104   ;;  %s917_s29 = smov (!%p191_p3), 8  }
   0x9   : > { %s918_s30 = smov (!%p191_p3), 16   ;;  %s919_s4 = smov (!%p191_p3), 24  }
   0xc   : > { %s1076_s12 = smov (!%p232_p4, %s898_s12), 1  ;;  %vm272_vm0 = vcmask 64512   ;;  %vm264_vm1 = vcmask 31744   ;;  %v908_v2 = vmov -inf   ;;  %v912_v6 = vmov 0  }
   0xd   : > { %s958_s16 = sshll.u32 %s1076_s12, 3  ;;  %265 = vst.msk [vmem:[#allocation2] sm:$0xff] %vm264_vm1, %v908_v2  ;;  %853 = vset.pattern.permute.xlu1 %v912_v6  ;;  %v913_v7 = vmov 0.0   ;;  %vm322_vm2 = vcmask 7168   ;;  %v914_v33 = vmov 1   ;;  %v915_v34 = vmov 2  }
   0xe   : > { %s245_s19 = scalar_lea.vmem %s1068_s1, %s958_s16  ;;  %s238_s22 = scalar_lea.vmem %s1067_s0, %s958_s16  ;;  %266 = vst.msk [vmem:[#allocation3] sm:$0xff] %vm264_vm1, %v913_v7  ;;  %854 = vset.pattern.permute.xlu2 %v914_v33  ;;  %855 = vset.pattern.permute.xlu0 %v915_v34  ;;  %v916_v35 = vmov 3   ;;  %vm408_vm3 = vcmask 15368   ;;  %vm503_vm4 = vcmask 23568   ;;  %vm597_vm5 = vcmask 31768  }
   0xf   : > { %v270_v0 = vld [vmem:[%s245_s19] sm:$0xff]  ;;  %s252_s28 = scalar_lea.vmem %s1069_s2, %s958_s16  ;;  %vm267_vm6 = vcmask 261120   ;;  %vm449_vm7 = vcmask 130112   ;;  %vm543_vm8 = vcmask 195712   ;;  %vm637_vm9 = vcmask 261312   ;;  %s259_s7 = scalar_lea.vmem %s1070_s3, %s958_s16 }
  0x10   : > { %803 = vmatpush.xpose.msk.msra.mxu0 %vm272_vm0, %v270_v0  ;;  %v269_v1 = vld [vmem:[%s238_s22] sm:$0xff]  ;;  %454 = vrot.lane.b32.xlu2 %v270_v0, %s909_s23  ;;  %268 = vst.msk [vmem:[#allocation4] sm:$0xff] %vm267_vm6, %v913_v7  ;;  %vm681_vm14 = vcmask 130048   ;;  %vm683_vm15 = vcmask 195584  }
  0x11   : > { %v271_v13 = vld [vmem:[%s252_s28] sm:$0xff] }
  0x12   : > { %349 = vmatpush.msra.mxu1 %v271_v13 }
  0x13   : > { %804 = vmatmul.msk.f32.vlgmr.msra.gmra.mxu0 %vm272_vm0, %v269_v1 }
  0x14   : > { %v979_v8 = vld [vmem:[#allocation2] sm:$0xff] }
  0x18   : > { %452 = vrot.lane.b32.xlu2 %v269_v1, %s909_s23 }
  0x20   : > { %546 = vrot.lane.b32.xlu2 %v269_v1, %s911_s25 }
  0x6a   : > { %v455_v14 = vpop.permute.xlu2 %454 }
  0x6b   : > { %809 = vmatpush.xpose.msk.msrb.mxu1 %vm272_vm0, %v455_v14  ;;  %v316_v14 = vld [vmem:[#allocation3] sm:$0xff] }
  0x72   : > { %v453_v19 = vpop.permute.xlu2 %452 }
  0x7a   : > { %v547_v22 = vpop.permute.xlu2 %546 }
  0x90   : > { %v296_v3 = vpop.f32.mrf.mxu0 }
  0x91   : > { %v299_v4 = vmul.f32 0.35355338, %v296_v3 }
  0x93   : > { %v301_v5 = vsel %vm272_vm0, %v299_v4, -inf }
  0x94   : > { %302 = vmax.xlane.f32.xlu0 %v301_v5 }
  0xa8   : > { %359 = vrot.lane.b32.xlu0 %v270_v0, %s910_s24 }
 0x107   : > { %v303_v9 = vpop.xlane.xlu0 %302 }
 0x108   : > { %v304_v10 = vmax.f32 %v979_v8, %v303_v9 }
 0x10a   : > { %v305_v11 = vsub.f32 %v979_v8, %v304_v10  ;;  %356 = vst.msk [vmem:[#allocation2] sm:$0xff] %vm322_vm2, %v304_v10  ;;  %310 = vperm.xlu1 %853, %v304_v10  }
 0x10c   : > { %v306_v43 = vmul.f32 1.442695, %v305_v11 }
 0x111   : > { %v386_v36 = vld [vmem:[#allocation2] sm:$0xff] }
 0x112   : > { %357 = vrot.lane.b32.xlu1 %v269_v1, %s910_s24  ;;  %v324_v1 = vld [vmem:[#allocation4] sm:$0xff] }
 0x113   : > { %856 = vset.pattern.permute.xlu1 %v916_v35 }
 0x11a   : > { %548 = vrot.lane.b32.xlu1 %v270_v0, %s911_s25  ;;  %v360_v12 = vpop.permute.xlu0 %359 }
 0x11b   : > { %806 = vmatpush.xpose.msk.msra.mxu2 %vm272_vm0, %v360_v12 }
 0x17c   : > { %v311_v15 = vpop.permute.xlu1 %310 }
 0x17d   : > { %v313_v16 = vsub.f32 %v299_v4, %v311_v15 }
 0x17f   : > { %v314_v17 = vmul.f32 1.442695, %v313_v16 }
 0x181   : > { %866 = vpow2.f32 %v314_v17 }
 0x182   : > { %868 = vpow2.f32 %v306_v43 }
 0x184   : > { %v358_v18 = vpop.permute.xlu1 %357 }
 0x185   : > { %807 = vmatmul.msk.f32.vlgmr.msra.gmra.mxu2 %vm272_vm0, %v358_v18 }
 0x187   : > { %v867_v20 = vpop.eup %866 }
 0x188   : > { %805 = vmatmul.msk.f32.vlgmr.msra.gmra.mxu1 %vm272_vm0, %v867_v20  ;;  %v869_v50 = vpop.eup %868  ;;  %v318_v52 = vsel %vm272_vm0, %v867_v20, 0.0 }
 0x189   : > { %v317_v15 = vmul.f32 %v869_v50, %v316_v14 }
 0x18c   : > { %v549_v21 = vpop.permute.xlu1 %548 }
 0x18d   : > { %812 = vmatpush.xpose.msk.msrb.mxu0 %vm272_vm0, %v549_v21 }
 0x190   : > { %810 = vmatmul.msk.f32.vlgmr.msrb.gmra.mxu1 %vm272_vm0, %v453_v19  ;;  %813 = vmatmul.msk.f32.vlgmr.msrb.gmra.mxu0 %vm272_vm0, %v547_v22 }
 0x205   : > { %v997_v23 = vpop.f32.mrf.mxu1 }
 0x208   : > { %v382_v24 = vpop.f32.mrf.mxu2 }
 0x209   : > { %v999_v25 = vmul.f32 0.35355338, %v382_v24 }
 0x20b   : > { %v387_v26 = vsel %vm272_vm0, %v999_v25, -inf }
 0x20c   : > { %388 = vmax.xlane.f32.xlu1 %v387_v26 }
 0x20d   : > { %v477_v27 = vpop.f32.mrf.mxu1  ;;  %v571_v28 = vpop.f32.mrf.mxu0 }
 0x20e   : > { %v1003_v29 = vmul.f32 0.35355338, %v477_v27  ;;  %v1005_v30 = vmul.f32 0.35355338, %v571_v28 }
 0x210   : > { %v482_v31 = vsel %vm272_vm0, %v1003_v29, -inf  ;;  %v576_v32 = vsel %vm272_vm0, %v1005_v30, -inf }
 0x211   : > { %483 = vmax.xlane.f32.xlu2 %v482_v31  ;;  %577 = vmax.xlane.f32.xlu0 %v576_v32 }
 0x225   : > { %418 = vrot.lane.b32.xlu1 %v271_v13, %s910_s24 }
 0x27f   : > { %v389_v37 = vpop.xlane.xlu1 %388 }
 0x280   : > { %v390_v38 = vmax.f32 %v386_v36, %v389_v37 }
 0x282   : > { %451 = vst.msk [vmem:[#allocation2] sm:$0xff] %vm408_vm3, %v390_v38  ;;  %396 = vperm.xlu2 %854, %v390_v38   ;;  %v391_v46 = vsub.f32 %v386_v36, %v390_v38 }
 0x284   : > { %v484_v39 = vpop.xlane.xlu2 %483  ;;  %v578_v44 = vpop.xlane.xlu0 %577  ;;  %v392_v49 = vmul.f32 1.442695, %v391_v46 }
 0x286   : > { %870 = vpow2.f32 %v392_v49 }
 0x289   : > { %v481_v40 = vld [vmem:[#allocation2] sm:$0xff] }
 0x28a   : > { %v485_v41 = vmax.f32 %v481_v40, %v484_v39  ;;  %512 = vrot.lane.b32.xlu2 %v271_v13, %s909_s23 }
 0x28b   : > { %857 = vset.pattern.permute.xlu2 %v912_v6 }
 0x28c   : > { %v486_v42 = vsub.f32 %v481_v40, %v485_v41  ;;  %545 = vst.msk [vmem:[#allocation2] sm:$0xff] %vm503_vm4, %v485_v41  ;;  %491 = vperm.xlu0 %855, %v485_v41   ;;  %v871_v51 = vpop.eup %870 }
 0x28e   : > { %v487_v54 = vmul.f32 1.442695, %v486_v42 }
 0x290   : > { %872 = vpow2.f32 %v487_v54 }
 0x292   : > { %606 = vrot.lane.b32.xlu2 %v271_v13, %s911_s25 }
 0x293   : > { %v575_v45 = vld [vmem:[#allocation2] sm:$0xff] }
 0x294   : > { %v579_v47 = vmax.f32 %v575_v45, %v578_v44  ;;  %862 = vset.pattern.permute.xlu0 %v914_v33 }
 0x296   : > { %v580_v48 = vsub.f32 %v575_v45, %v579_v47  ;;  %639 = vst.msk [vmem:[#allocation2] sm:$0xff] %vm597_vm5, %v579_v47  ;;  %585 = vperm.xlu1 %856, %v579_v47   ;;  %v1024_v56 = vpop.eup %872 }
 0x297   : > { %v419_v53 = vpop.permute.xlu1 %418 }
 0x298   : > { %439 = vmatpush.msra.mxu3 %v419_v53  ;;  %v581_v55 = vmul.f32 1.442695, %v580_v48 }
 0x29a   : > { %327 = vperm.xlu2 %857, %v869_v50   ;;  %874 = vpow2.f32 %v581_v55 }
 0x29e   : > { %859 = vset.pattern.permute.xlu1 %v915_v34 }
 0x2a0   : > { %v1028_v60 = vpop.eup %874 }
 0x2a2   : > { %858 = vset.pattern.permute.xlu2 %v914_v33 }
 0x2a3   : > { %413 = vperm.xlu2 %858, %v871_v51  }
 0x2c0   : > { %319 = vadd.xlane.f32.xlu1 %v318_v52 }
 0x2d9   : > { %508 = vperm.xlu1 %859, %v1024_v56  }
 0x2dc   : > { %v397_v57 = vpop.permute.xlu2 %396 }
 0x2dd   : > { %v399_v58 = vsub.f32 %v999_v25, %v397_v57 }
 0x2df   : > { %v400_v59 = vmul.f32 1.442695, %v399_v58 }
 0x2e1   : > { %876 = vpow2.f32 %v400_v59  ;;  %860 = vset.pattern.permute.xlu1 %v916_v35 }
 0x2e2   : > { %602 = vperm.xlu1 %860, %v1028_v60  }
 0x2e4   : > { %v513_v61 = vpop.permute.xlu2 %512 }
 0x2e5   : > { %533 = vmatpush.msrb.mxu3 %v513_v61 }
 0x2e7   : > { %v877_v62 = vpop.eup %876 }
 0x2e8   : > { %808 = vmatmul.msk.f32.vlgmr.msra.gmra.mxu3 %vm272_vm0, %v877_v62  ;;  %v404_v63 = vsel %vm272_vm0, %v877_v62, 0.0 }
 0x2e9   : > { %405 = vadd.xlane.f32.xlu0 %v404_v63 }
 0x2ea   : > { %861 = vset.pattern.permute.xlu1 %v912_v6 }
 0x2ec   : > { %v607_v0 = vpop.permute.xlu2 %606 }
 0x2ed   : > { %627 = vmatpush.msrb.mxu2 %v607_v0 }
 0x2f4   : > { %v328_v2 = vpop.permute.xlu2 %327 }
 0x2f5   : > { %v330_v3 = vmul.f32 %v328_v2, %v324_v1 }
 0x2f7   : > { %v354_v4 = vadd.f32 %v997_v23, %v330_v3 }
 0x2f9   : > { %355 = vst.msk [vmem:[#allocation4] sm:$0xff] %vm272_vm0, %v354_v4 }
 0x2fd   : > { %v414_v26 = vpop.permute.xlu2 %413 }
 0x2fe   : > { %v492_v5 = vpop.permute.xlu0 %491 }
 0x2ff   : > { %v494_v7 = vsub.f32 %v1003_v29, %v492_v5 }
 0x300   : > { %v410_v27 = vld [vmem:[#allocation4] sm:$0xff] }
 0x301   : > { %v495_v8 = vmul.f32 1.442695, %v494_v7  ;;  %v416_v28 = vmul.f32 %v414_v26, %v410_v27 }
 0x303   : > { %878 = vpow2.f32 %v495_v8 }
 0x308   : > { %v586_v9 = vpop.permute.xlu1 %585 }
 0x309   : > { %v879_v10 = vpop.eup %878  ;;  %v588_v11 = vsub.f32 %v1005_v30, %v586_v9 }
 0x30a   : > { %811 = vmatmul.msk.f32.vlgmr.msrb.gmra.mxu3 %vm272_vm0, %v879_v10  ;;  %v499_v24 = vsel %vm272_vm0, %v879_v10, 0.0 }
 0x30b   : > { %v589_v6 = vmul.f32 1.442695, %v588_v11 }
 0x30d   : > { %880 = vpow2.f32 %v589_v6 }
 0x313   : > { %v881_v12 = vpop.eup %880 }
 0x314   : > { %814 = vmatmul.msk.f32.vlgmr.msrb.gmra.mxu2 %vm272_vm0, %v881_v12  ;;  %v593_v13 = vsel %vm272_vm0, %v881_v12, 0.0 }
 0x315   : > { %594 = vadd.xlane.f32.xlu0 %v593_v13 }
 0x333   : > { %v320_v16 = vpop.xlane.xlu1 %319 }
 0x334   : > { %v321_v17 = vadd.f32 %v320_v16, %v317_v15 }
 0x336   : > { %323 = vst.msk [vmem:[#allocation3] sm:$0xff] %vm322_vm2, %v321_v17 }
 0x33d   : > { %v402_v18 = vld [vmem:[#allocation3] sm:$0xff] }
 0x33e   : > { %v403_v19 = vmul.f32 %v871_v51, %v402_v18 }
 0x34b   : > { %v509_v33 = vpop.permute.xlu1 %508 }
 0x354   : > { %v603_v44 = vpop.permute.xlu1 %602 }
 0x35c   : > { %v406_v20 = vpop.xlane.xlu0 %405 }
 0x35d   : > { %v407_v21 = vadd.f32 %v406_v20, %v403_v19 }
 0x35f   : > { %409 = vst.msk [vmem:[#allocation3] sm:$0xff] %vm408_vm3, %v407_v21 }
 0x366   : > { %v497_v39 = vld [vmem:[#allocation3] sm:$0xff] }
 0x367   : > { %v498_v40 = vmul.f32 %v1024_v56, %v497_v39 }
 0x36b   : > { %v441_v22 = vpop.f32.mrf.mxu3 }
 0x36c   : > { %445 = vrot.lane.b32.xlu2 %v441_v22, %s917_s29 }
 0x388   : > { %v595_v31 = vpop.xlane.xlu0 %594 }
 0x38d   : > { %v535_v23 = vpop.f32.mrf.mxu3 }
 0x38e   : > { %539 = vrot.lane.b32.xlu0 %v535_v23, %s918_s30 }
 0x395   : > { %500 = vadd.xlane.f32.xlu2 %v499_v24 }
 0x397   : > { %v629_v25 = vpop.f32.mrf.mxu2 }
 0x3ad   : > { %633 = vrot.lane.b32.xlu2 %v629_v25, %s919_s4 }
 0x3c6   : > { %v446_v29 = vpop.permute.xlu2 %445 }
 0x3c7   : > { %v448_v30 = vadd.f32 %v446_v29, %v416_v28 }
 0x3c9   : > { %450 = vst.msk [vmem:[#allocation4] sm:$0xff] %vm449_vm7, %v448_v30 }
 0x3d0   : > { %v505_v32 = vld [vmem:[#allocation4] sm:$0xff] }
 0x3d1   : > { %v511_v36 = vmul.f32 %v509_v33, %v505_v32 }
 0x400   : > { %v540_v37 = vpop.permute.xlu0 %539 }
 0x401   : > { %v542_v38 = vadd.f32 %v540_v37, %v511_v36 }
 0x403   : > { %544 = vst.msk [vmem:[#allocation4] sm:$0xff] %vm543_vm8, %v542_v38 }
 0x408   : > { %v501_v41 = vpop.xlane.xlu2 %500 }
 0x409   : > { %v502_v42 = vadd.f32 %v501_v41, %v498_v40 }
 0x40a   : > { %v599_v43 = vld [vmem:[#allocation4] sm:$0xff] }
 0x40b   : > { %504 = vst.msk [vmem:[#allocation3] sm:$0xff] %vm503_vm4, %v502_v42  ;;  %v605_v45 = vmul.f32 %v603_v44, %v599_v43 }
 0x410   : > { %v634_v46 = vpop.permute.xlu2 %633 }
 0x411   : > { %v636_v47 = vadd.f32 %v634_v46, %v605_v45 }
 0x412   : > { %v591_v48 = vld [vmem:[#allocation3] sm:$0xff] }
 0x413   : > { %v592_v49 = vmul.f32 %v1028_v60, %v591_v48  ;;  %638 = vst.msk [vmem:[#allocation4] sm:$0xff] %vm637_vm9, %v636_v47 }
 0x415   : > { %v596_v50 = vadd.f32 %v595_v31, %v592_v49 }
 0x417   : > { %598 = vst.msk [vmem:[#allocation3] sm:$0xff] %vm597_vm5, %v596_v50 }
 0x41a   : > { %v658_v1 = vld [vmem:[#allocation4] sm:$0xff] }
 0x41e   : > { %v643_v51 = vld [vmem:[#allocation3] sm:$0xff] }
 0x41f   : > { %882 = vrcp.f32 %v643_v51  ;;  %v655_v55 = vand.u32 2147483648, %v643_v51  ;;  %v653_v57 = vand.u32 2147483647, %v643_v51  ;;  %vm649_vm11 = vweird.f32 %v643_v51 }
 0x421   : > { %v656_v59 = vor.u32 1.1754944e-38, %v655_v55  ;;  %vm654_vm13 = vcmp.eq.f32.partialorder %v653_v57, 8.507059e+37 }
 0x425   : > { %v883_v52 = vpop.eup %882 }
 0x426   : > { %v645_v53 = vmul.f32 %v883_v52, %v643_v51  ;;  %vm650_vm10 = vweird.f32 %v883_v52 }
 0x427   : > { %vm651_vm12 = vmor %vm649_vm11, %vm650_vm10 }
 0x428   : > { %v646_v54 = vsub.f32 1.0, %v645_v53 }
 0x42a   : > { %v647_v56 = vmul.f32 %v883_v52, %v646_v54 }
 0x42c   : > { %v648_v58 = vadd.f32 %v883_v52, %v647_v56 }
 0x42e   : > { %v652_v61 = vsel %vm651_vm12, %v883_v52, %v648_v58 }
 0x42f   : > { %v657_v60 = vsel %vm654_vm13, %v656_v59, %v652_v61 }
 0x430   : > { %666 = vperm.xlu0 %862, %v657_v60   ;;  %661 = vperm.xlu1 %861, %v657_v60  }
 0x438   : > { %863 = vset.pattern.permute.xlu1 %v915_v34  ;;  %865 = vset.pattern.permute.xlu0 %v916_v35 }
 0x439   : > { %671 = vperm.xlu1 %863, %v657_v60  }
 0x441   : > { %864 = vset.pattern.permute.xlu1 %v916_v35 }
 0x442   : > { %676 = vperm.xlu1 %864, %v657_v60  }
 0x4a2   : > { %v662_v62 = vpop.permute.xlu1 %661  ;;  %v667_v0 = vpop.permute.xlu0 %666 }
 0x4a3   : > { %v664_v2 = vmul.f32 %v662_v62, %v658_v1  ;;  %v669_v3 = vmul.f32 %v667_v0, %v658_v1 }
 0x4a5   : > { %v680_v7 = vsel %vm272_vm0, %v664_v2, %v669_v3 }
 0x4ab   : > { %v672_v63 = vpop.permute.xlu1 %671 }
 0x4ac   : > { %v674_v4 = vmul.f32 %v672_v63, %v658_v1 }
 0x4ae   : > { %v682_v8 = vsel %vm681_vm14, %v680_v7, %v674_v4 }
 0x4b4   : > { %v677_v5 = vpop.permute.xlu1 %676 }
 0x4b5   : > { %v679_v34 = vmul.f32 %v677_v5, %v658_v1 }
 0x4b7   : > { %v684_v35 = vsel %vm683_vm15, %v682_v8, %v679_v34 }
 0x4b8   : > { %686 = vst.msk [vmem:[%s259_s7] sm:$0xff] %vm267_vm6, %v684_v35 }
 0x4b9 PF: > { %s13_s14 = sadd.s32 1, %s906_s14   ;;  %s1071_s12 = smov %s902_s13 }
 0x4ba   : > { %p10_p5 = scmp.ge.s32.totalorder %s13_s14, 4   ;;  %s1072_s13 = smov %s1074_s15 }
 0x4bc   :  { %12 = sbr.rel (!%p10_p5) target bundleno = 2 (0x2), region = 76 }

// kernel: decoder_layer.3
= control target key start
LH: loop header
LB: loop body
LE: loop exit
PB: predicated region body
PF: predicated region fallthrough
CT: control target
= control target key end

     0   :  { %13 = vsyncpa [#allocation3], 0  ;;  %s775_s24 = smov 0   ;;  %s777_s25 = smov 0   ;;  %s839_s0 = inlined_call_operand.vmem [shape: f32[2,8,32], index: 0, kind: input, shape index: {}]   ;;  %s840_s1 = inlined_call_operand.vmem [shape: f32[1,32], index: 1, kind: input, shape index: {}]   ;;  %s841_s2 = inlined_call_operand.vmem [shape: f32[1,32], index: 2, kind: input, shape index: {}]   ;;  %s842_s3 = inlined_call_operand.hbm [shape: f32[32,96], index: 3, kind: input, shape index: {}]   ;;  %s843_s4 = inlined_call_operand.vmem [shape: f32[1,96], index: 4, kind: input, shape index: {}]   ;;  %s844_s5 = inlined_call_operand.vmem [shape: f32[2,8,32], index: 5, kind: output, shape index: {0}]   ;;  %s845_s6 = inlined_call_operand.vmem [shape: f32[2,8,32], index: 6, kind: output, shape index: {1}]   ;;  %s846_s7 = inlined_call_operand.vmem [shape: f32[2,8,32], index: 7, kind: output, shape index: {2}]  }
   0x1   :  { %s779_s26 = smov 0  }
   0x2 LB: > { %s610_s27 = sadd.s32 4294967295, %s727_s26   ;;  %s31_s28 = sadd.s32 1, %s723_s25  ;;  %s727_s26 = sphi %s779_s26, %s19_s26   ;;  %s723_s25 = sphi %s777_s25, %s848_s25   ;;  %s719_s24 = sphi %s775_s24, %s847_s24  }
   0x3   : > { %p33_p0 = scmp.ge.s32.totalorder %s31_s28, 2  ;;  %p612_p1 = scmp.ge.s32.totalorder %s727_s26, 1 }
   0x4   : > { %p232_p2 = scmp.lt.s32.totalorder %s727_s26, 3  ;;  %p632_p4 = scmp.eq.s32.totalorder %s610_s27, 0 }
   0x5   : > { %s850_s28 = smov (%p33_p0, %s31_s28), 0  ;;  %s249_s8 = sshll.u32 %s842_s3, 4  ;;  %s250_s8 = int_to_ptr.hbm [resolvable:$true] %s249_s8 }
   0x6   : > { %p233_p3 = pnand %p612_p1, %p232_p2  ;;  %s729_s9 = smov [#allocation2]  }
   0x7   : > { %s251_s10 = sshll.u32 %s729_s9, 4  ;;  %s730_s11 = smov 128   ;;  %s252_s10 = int_to_ptr.vmem [resolvable:$true] %s251_s10 }
   0x8   : > { %p628_p5 = pneg %p233_p3  ;;  %s731_s12 = smov 8  }
   0x9   : > { %280 = sbr.rel (%p233_p3) target bundleno = 541 (0x21d), region = 40 }
   0xa   : > { %p629_p6 = pnand %p632_p4, %p628_p5 }
   0xc   : > { %631 = dma.hbm_to_vmem [thread:$0]  (!%p629_p6), %s250_s8, 512, %s252_s10, [#allocation3], %s730_s11, %s730_s11, %s731_s12  }
   0xe   : > { %714 = dma.done.wait (%p632_p4), [#allocation3], 512  }
   0xf   : > { %716 = vsyncadd (%p632_p4), [#allocation3], 4294966784  ;;  %p331_p7 = scmp.lt.s32.totalorder %s719_s24, 1  ;;  %vm360_vm0 = vcmask 261120   ;;  %v732_v2 = vmov 32.0   ;;  %v403_v14 = vld [vmem:[#allocation2 + $0x18] sm:$0xff] }
  0x10   : > { %667 = vrcp.f32 %v732_v2  ;;  %423 = vmatpush.msra.mxu0 %v403_v14  ;;  %v402_v15 = vld [vmem:[#allocation2 + $0x10] sm:$0xff]  ;;  %v401_v16 = vld [vmem:[#allocation2 + $0x8] sm:$0xff]  ;;  %v400_v17 = vld [vmem:[#allocation2] sm:$0xff]  ;;  %s733_s29 = smov 96   ;;  %s734_s30 = smov 64  }
  0x11   : > { %s852_s24 = smov (!%p331_p7, %s719_s24), 1  ;;  %v664_v27 = vld [vmem:[%s840_s1] ss:$0 sm:$0xff] }
  0x12   : > { %s797_s13 = sshll.u32 %s852_s24, 3  ;;  %424 = vmatpush.msra.mxu0 %v402_v15  ;;  %v665_v30 = vld [vmem:[%s841_s2] ss:$0 sm:$0xff] }
  0x13   : > { %s337_s16 = scalar_lea.vmem %s839_s0, %s797_s13  ;;  %v666_v33 = vld [vmem:[%s843_s4] ss:$0 sm:$0xff]  ;;  %s344_s27 = scalar_lea.vmem %s844_s5, %s797_s13 }
  0x14   : > { %v359_v0 = vld [vmem:[%s337_s16] sm:$0xff]  ;;  %425 = vmatpush.msra.mxu0 %v401_v16  ;;  %s351_s10 = scalar_lea.vmem %s845_s6, %s797_s13  ;;  %s358_s14 = scalar_lea.vmem %s846_s7, %s797_s13 }
  0x15   : > { %v361_v1 = vsel %vm360_vm0, %v359_v0, 0.0 }
  0x16   : > { %362 = vadd.xlane.f32.xlu0 %v361_v1  ;;  %v668_v3 = vpop.eup %667  ;;  %426 = vmatpush.msra.mxu0 %v400_v17 }
  0x17   : > { %v365_v4 = vmul.f32 32.0, %v668_v3  ;;  %vm369_vm1 = vweird.f32 %v668_v3 }
  0x19   : > { %v366_v5 = vsub.f32 1.0, %v365_v4 }
  0x1b   : > { %v367_v6 = vmul.f32 %v668_v3, %v366_v5 }
  0x1d   : > { %v368_v7 = vadd.f32 %v668_v3, %v367_v6 }
  0x1f   : > { %v370_v8 = vsel %vm369_vm1, %v668_v3, %v368_v7 }
  0x89   : > { %v363_v9 = vpop.xlane.xlu0 %362 }
  0x8a   : > { %v371_v10 = vmul.f32 %v370_v8, %v363_v9 }
  0x8c   : > { %v372_v11 = vsub.f32 %v359_v0, %v371_v10 }
  0x8e   : > { %v373_v12 = vmul.f32 %v372_v11, %v372_v11 }
  0x90   : > { %v374_v13 = vsel %vm360_vm0, %v373_v12, 0.0 }
  0x91   : > { %375 = vadd.xlane.f32.xlu0 %v374_v13 }
 0x104   : > { %v376_v18 = vpop.xlane.xlu0 %375 }
 0x105   : > { %v377_v19 = vmul.f32 %v376_v18, %v370_v8 }
 0x107   : > { %v378_v20 = vadd.f32 1e-05, %v377_v19 }
 0x109   : > { %669 = vrsqrt.f32 %v378_v20  ;;  %vm385_vm3 = vweird.f32 %v378_v20 }
 0x10f   : > { %v670_v21 = vpop.eup %669 }
 0x110   : > { %v380_v22 = vmul.f32 %v670_v21, %v378_v20  ;;  %vm386_vm2 = vweird.f32 %v670_v21 }
 0x111   : > { %vm387_vm4 = vmor %vm385_vm3, %vm386_vm2 }
 0x112   : > { %v381_v23 = vmul.f32 %v670_v21, %v380_v22 }
 0x114   : > { %v382_v24 = vmul.f32 0.5, %v381_v23 }
 0x116   : > { %v383_v25 = vsub.f32 1.5, %v382_v24 }
 0x118   : > { %v384_v26 = vmul.f32 %v670_v21, %v383_v25 }
 0x11a   : > { %v388_v28 = vsel %vm387_vm4, %v670_v21, %v384_v26 }
 0x11b   : > { %v389_v29 = vmul.f32 %v388_v28, %v372_v11 }
 0x11d   : > { %v394_v31 = vmul.f32 %v664_v27, %v389_v29 }
 0x11f   : > { %v399_v32 = vadd.f32 %v665_v30, %v394_v31 }
 0x121   : > { %621 = vmatmul.msk.f32.vlgmr.msra.gmra.mxu0 %vm360_vm0, %v399_v32 }
 0x19e   : > { %v428_v34 = vpop.f32.mrf.mxu0 }
 0x19f   : > { %v429_v35 = vadd.f32 %v666_v33, %v428_v34 }
 0x1a1   : > { %431 = vst.msk [vmem:[%s344_s27] sm:$0xff] %vm360_vm0, %v429_v35  ;;  %433 = vrot.lane.b32.xlu1 %v429_v35, %s733_s29 }
 0x1a9   : > { %437 = vrot.lane.b32.xlu1 %v429_v35, %s734_s30 }
 0x213   : > { %v434_v36 = vpop.permute.xlu1 %433 }
 0x214   : > { %436 = vst.msk [vmem:[%s351_s10] sm:$0xff] %vm360_vm0, %v434_v36 }
 0x21b   : > { %v438_v37 = vpop.permute.xlu1 %437 }
 0x21c   : > { %440 = vst.msk [vmem:[%s358_s14] sm:$0xff] %vm360_vm0, %v438_v37 }
 0x21d PF: > { %s19_s26 = sadd.s32 1, %s727_s26   ;;  %s847_s24 = smov %s723_s25 }
 0x21e   : > { %p16_p8 = scmp.ge.s32.totalorder %s19_s26, 4   ;;  %s848_s25 = smov %s850_s28 }
 0x220   :  { %18 = sbr.rel (!%p16_p8) target bundleno = 2 (0x2), region = 99 }
 0x225   :  { %506 = vsyncpa [#allocation3], 1 }
 0x226   :  { %508 = vsyncpa [#allocation3 + $0x1], 1 }

// kernel: decoder_layer.5
= control target key start
LH: loop header
LB: loop body
LE: loop exit
PB: predicated region body
PF: predicated region fallthrough
CT: control target
= control target key end

     0   :  { %s774_s13 = smov 0   ;;  %s776_s14 = smov 0   ;;  %s888_s0 = inlined_call_operand.vmem [shape: f32[2,8,32], index: 0, kind: input, shape index: {}]   ;;  %s889_s1 = inlined_call_operand.vmem [shape: f32[2,8,32], index: 1, kind: input, shape index: {}, may-alias: {1,10}]   ;;  %s890_s2 = inlined_call_operand.vmem [shape: f32[32,32], index: 2, kind: input, shape index: {}]   ;;  %s891_s3 = inlined_call_operand.vmem [shape: f32[1,32], index: 3, kind: input, shape index: {}]   ;;  %s892_s4 = inlined_call_operand.vmem [shape: f32[1,32], index: 4, kind: input, shape index: {}]   ;;  %s893_s5 = inlined_call_operand.vmem [shape: f32[1,32], index: 5, kind: input, shape index: {}]   ;;  %s894_s6 = inlined_call_operand.vmem [shape: f32[32,64], index: 6, kind: input, shape index: {}]   ;;  %s895_s7 = inlined_call_operand.vmem [shape: f32[1,64], index: 7, kind: input, shape index: {}]   ;;  %s896_s8 = inlined_call_operand.vmem [shape: f32[64,32], index: 8, kind: input, shape index: {}]   ;;  %s897_s9 = inlined_call_operand.vmem [shape: f32[1,32], index: 9, kind: input, shape index: {}]   ;;  %s898_s10 = inlined_call_operand.vmem [shape: f32[2,8,32], index: 10, kind: output, shape index: {}, may-alias: {1,10}]  }
   0x1   :  { %s778_s15 = smov 0  }
   0x2 LB: > { %s32_s16 = sadd.s32 1, %s712_s14  ;;  %p651_p0 = scmp.ge.s32.totalorder %s716_s15, 1  ;;  %s716_s15 = sphi %s778_s15, %s20_s15   ;;  %s712_s14 = sphi %s776_s14, %s900_s14   ;;  %s708_s13 = sphi %s774_s13, %s899_s13  }
   0x3   : > { %p34_p1 = scmp.ge.s32.totalorder %s32_s16, 2  ;;  %p344_p2 = scmp.lt.s32.totalorder %s716_s15, 3 }
   0x5   : > { %s902_s16 = smov (%p34_p1, %s32_s16), 0  ;;  %p345_p3 = pnand %p651_p0, %p344_p2 }
   0x6   : > { %p393_p4 = scmp.lt.s32.totalorder (!%p345_p3), %s708_s13, 1 }
   0x7   : > { %348 = sbr.rel (%p345_p3) target bundleno = 685 (0x2ad), region = 60 }
   0xc   : > { %v418_v0 = vld [vmem:[%s890_s2 + $0x18] sm:$0xff]  ;;  %v417_v1 = vld [vmem:[%s890_s2 + $0x10] sm:$0xff]  ;;  %v416_v2 = vld [vmem:[%s890_s2 + $0x8] sm:$0xff]  ;;  %s904_s13 = smov (!%p393_p4, %s708_s13), 1  ;;  %vm423_vm0 = vcmask 261120   ;;  %v718_v11 = vmov 32.0  }
   0xd   : > { %439 = vmatpush.msra.mxu0 %v418_v0  ;;  %v415_v3 = vld [vmem:[%s890_s2] sm:$0xff]  ;;  %s804_s25 = sshll.u32 %s904_s13, 3  ;;  %690 = vrcp.f32 %v718_v11  ;;  %v491_v23 = vld [vmem:[%s894_s6 + $0x18] sm:$0xff]  ;;  %v490_v24 = vld [vmem:[%s894_s6 + $0x10] sm:$0xff]  ;;  %vm532_vm5 = vcmask 523264  }
   0xe   : > { %s399_s28 = scalar_lea.vmem %s888_s0, %s804_s25  ;;  %s406_s11 = scalar_lea.vmem %s889_s1, %s804_s25  ;;  %v685_v5 = vld [vmem:[%s891_s3] ss:$0 sm:$0xff]  ;;  %511 = vmatpush.msra.mxu1 %v491_v23  ;;  %v489_v25 = vld [vmem:[%s894_s6 + $0x8] sm:$0xff]  ;;  %v527_v27 = vld [vmem:[%s896_s8 + $0x38] sm:$0xff] }
   0xf   : > { %440 = vmatpush.msra.mxu0 %v417_v1  ;;  %v414_v4 = vld [vmem:[%s399_s28] sm:$0xff]  ;;  %v526_v28 = vld [vmem:[%s896_s8 + $0x30] sm:$0xff]  ;;  %544 = vmatpush.msra.mxu2 %v527_v27  ;;  %v525_v29 = vld [vmem:[%s896_s8 + $0x28] sm:$0xff]  ;;  %s413_s19 = scalar_lea.vmem %s898_s10, %s804_s25 }
  0x10   : > { %v447_v7 = vld [vmem:[%s406_s11] sm:$0xff]  ;;  %512 = vmatpush.msra.mxu1 %v490_v24  ;;  %v523_v34 = vld [vmem:[%s896_s8 + $0x18] sm:$0xff]  ;;  %v522_v47 = vld [vmem:[%s896_s8 + $0x10] sm:$0xff] }
  0x11   : > { %441 = vmatpush.msra.mxu0 %v416_v2  ;;  %v488_v26 = vld [vmem:[%s894_s6] sm:$0xff]  ;;  %545 = vmatpush.msra.mxu2 %v526_v28  ;;  %v521_v48 = vld [vmem:[%s896_s8 + $0x8] sm:$0xff] }
  0x12   : > { %513 = vmatpush.msra.mxu1 %v489_v25  ;;  %v524_v32 = vld [vmem:[%s896_s8 + $0x20] sm:$0xff] }
  0x13   : > { %442 = vmatpush.msra.mxu0 %v415_v3  ;;  %v691_v12 = vpop.eup %690  ;;  %546 = vmatpush.msra.mxu2 %v525_v29  ;;  %v686_v41 = vld [vmem:[%s892_s4] ss:$0 sm:$0xff] }
  0x14   : > { %655 = vmatmul.msk.f32.vlgmr.msra.gmra.mxu0 %vm423_vm0, %v414_v4  ;;  %v453_v13 = vmul.f32 32.0, %v691_v12  ;;  %vm457_vm1 = vweird.f32 %v691_v12  ;;  %514 = vmatpush.msra.mxu1 %v488_v26  ;;  %v687_v44 = vld [vmem:[%s893_s5] ss:$0 sm:$0xff] }
  0x15   : > { %547 = vmatpush.msra.mxu2 %v524_v32  ;;  %v520_v49 = vld [vmem:[%s896_s8] sm:$0xff] }
  0x16   : > { %v454_v14 = vsub.f32 1.0, %v453_v13  ;;  %v688_v50 = vld [vmem:[%s895_s7] ss:$0 sm:$0xff] }
  0x17   : > { %548 = vmatpush.msra.mxu2 %v523_v34  ;;  %v689_v54 = vld [vmem:[%s897_s9] ss:$0 sm:$0xff] }
  0x18   : > { %v455_v15 = vmul.f32 %v691_v12, %v454_v14 }
  0x19   : > { %549 = vmatpush.msra.mxu2 %v522_v47 }
  0x1a   : > { %v456_v16 = vadd.f32 %v691_v12, %v455_v15 }
  0x1b   : > { %550 = vmatpush.msra.mxu2 %v521_v48 }
  0x1c   : > { %v458_v17 = vsel %vm457_vm1, %v691_v12, %v456_v16 }
  0x1d   : > { %551 = vmatpush.msra.mxu2 %v520_v49 }
  0x91   : > { %v444_v6 = vpop.f32.mrf.mxu0 }
  0x92   : > { %v445_v8 = vadd.f32 %v685_v5, %v444_v6 }
  0x94   : > { %v818_v9 = vadd.f32 %v447_v7, %v445_v8 }
  0x96   : > { %v449_v10 = vsel %vm423_vm0, %v818_v9, 0.0 }
  0x97   : > { %450 = vadd.xlane.f32.xlu0 %v449_v10 }
 0x10a   : > { %v451_v18 = vpop.xlane.xlu0 %450 }
 0x10b   : > { %v459_v19 = vmul.f32 %v458_v17, %v451_v18 }
 0x10d   : > { %v460_v20 = vsub.f32 %v818_v9, %v459_v19 }
 0x10f   : > { %v461_v21 = vmul.f32 %v460_v20, %v460_v20 }
 0x111   : > { %v462_v22 = vsel %vm423_vm0, %v461_v21, 0.0 }
 0x112   : > { %463 = vadd.xlane.f32.xlu0 %v462_v22 }
 0x185   : > { %v464_v30 = vpop.xlane.xlu0 %463 }
 0x186   : > { %v465_v31 = vmul.f32 %v464_v30, %v458_v17 }
 0x188   : > { %v466_v33 = vadd.f32 1e-05, %v465_v31 }
 0x18a   : > { %692 = vrsqrt.f32 %v466_v33  ;;  %vm473_vm3 = vweird.f32 %v466_v33 }
 0x190   : > { %v693_v35 = vpop.eup %692 }
 0x191   : > { %v468_v36 = vmul.f32 %v693_v35, %v466_v33  ;;  %vm474_vm2 = vweird.f32 %v693_v35 }
 0x192   : > { %vm475_vm4 = vmor %vm473_vm3, %vm474_vm2 }
 0x193   : > { %v469_v37 = vmul.f32 %v693_v35, %v468_v36 }
 0x195   : > { %v470_v38 = vmul.f32 0.5, %v469_v37 }
 0x197   : > { %v471_v39 = vsub.f32 1.5, %v470_v38 }
 0x199   : > { %v472_v40 = vmul.f32 %v693_v35, %v471_v39 }
 0x19b   : > { %v476_v42 = vsel %vm475_vm4, %v693_v35, %v472_v40 }
 0x19c   : > { %v477_v43 = vmul.f32 %v476_v42, %v460_v20 }
 0x19e   : > { %v482_v45 = vmul.f32 %v686_v41, %v477_v43 }
 0x1a0   : > { %v487_v46 = vadd.f32 %v687_v44, %v482_v45 }
 0x1a2   : > { %656 = vmatmul.msk.f32.vlgmr.msra.gmra.mxu1 %vm423_vm0, %v487_v46 }
 0x21f   : > { %v516_v51 = vpop.f32.mrf.mxu1 }
 0x220   : > { %v517_v52 = vadd.f32 %v688_v50, %v516_v51 }
 0x222   : > { %v519_v53 = vmax.f32 %v517_v52, 0.0 }
 0x224   : > { %657 = vmatmul.msk.f32.vlgmr.msra.gmra.mxu2 %vm532_vm5, %v519_v53 }
 0x2a7   : > { %v553_v55 = vpop.f32.mrf.mxu2 }
 0x2a8   : > { %v554_v56 = vadd.f32 %v689_v54, %v553_v55 }
 0x2aa   : > { %v556_v57 = vadd.f32 %v554_v56, %v818_v9 }
 0x2ac   : > { %557 = vst.msk [vmem:[%s413_s19] sm:$0xff] %vm423_vm0, %v556_v57 }
 0x2ad PF: > { %s20_s15 = sadd.s32 1, %s716_s15   ;;  %s899_s13 = smov %s712_s14 }
 0x2ae   : > { %p17_p5 = scmp.ge.s32.totalorder %s20_s15, 4   ;;  %s900_s14 = smov %s902_s16 }
 0x2b0   :  { %19 = sbr.rel (!%p17_p5) target bundleno = 2 (0x2), region = 93 }

</bundles_post_ra>
